<compile_context>
chip_gen: v7x
topology: tpu7x:2x2x1
jax: 0.10.0
libtpu: 0.0.40
codegen_flags: <defaults>
</compile_context>

<pallas_src>
from functools import partial

import jax
import jax.numpy as jnp
from jax.experimental import pallas as pl
from jax.experimental.pallas import tpu as pltpu

IN_DIM = 784
HID_DIM = 256
OUT_DIM = 10
PAD_OUT = 128          # lane-dense class dimension (>= OUT_DIM, multiple of 128)


def _round_up(x, m):
    return ((x + m - 1) // m) * m


def _mlp_kernel(x_ref, w1_ref, b1_ref, w2_ref, b2_ref, o_ref):
    # x_ref:  (TB, 784) f32      w1_ref: (784, 256) bf16   b1_ref: (1, 256) f32
    # w2_ref: (256, 128) bf16 (zero-padded cols)           b2_ref: (1, 128) f32
    #   (padded bias entries are -1e30 so padded classes vanish in softmax)
    # o_ref:  (TB, 128) bf16
    x = x_ref[...].astype(jnp.bfloat16)          # in-kernel cast: x streams as f32 once

    # hidden = sigmoid(x @ W1 + b1); MXU accumulates in f32.
    h = jnp.dot(x, w1_ref[...], preferred_element_type=jnp.float32)
    h = h + b1_ref[...]
    h = 0.5 * (jnp.tanh(0.5 * h) + 1.0)          # sigmoid via EUP tanh (f32)

    # logits = h @ W2 + b2 over the padded (128-wide) class axis.
    logits = jnp.dot(h.astype(w2_ref.dtype), w2_ref[...],
                     preferred_element_type=jnp.float32)
    logits = logits + b2_ref[...]

    # Row-wise softmax (padded logits are ~-1e30 -> exp == 0, denom exact).
    m = jnp.max(logits, axis=-1, keepdims=True)
    e = jnp.exp(logits - m)
    denom = jnp.sum(e, axis=-1, keepdims=True)
    probs = e / denom                            # exact normalization (rows sum to 1)
    o_ref[...] = probs.astype(o_ref.dtype)


def prepare_params(w1, b1, w2, b2, *, mxu_dtype=jnp.bfloat16):
    """One-time weight prep (transpose to (in,out), pad classes, cast for MXU).

    Accepts torch.nn.Linear-layout weights: w1 (256,784), b1 (256,),
    w2 (10,256), b2 (10,).
    """
    w1_t = jnp.asarray(w1, jnp.float32).T.astype(mxu_dtype)        # (784, 256)
    b1_r = jnp.asarray(b1, jnp.float32).reshape(1, HID_DIM)        # (1, 256)

    w2_t = jnp.asarray(w2, jnp.float32).T                          # (256, 10)
    w2_p = jnp.zeros((HID_DIM, PAD_OUT), jnp.float32)
    w2_p = w2_p.at[:, :OUT_DIM].set(w2_t).astype(mxu_dtype)        # (256, 128)

    b2_p = jnp.full((1, PAD_OUT), -1e30, jnp.float32)
    b2_p = b2_p.at[0, :OUT_DIM].set(jnp.asarray(b2, jnp.float32))  # (1, 128)
    return w1_t, b1_r, w2_p, b2_p


@partial(jax.jit, static_argnames=("tile_b",))
def network_alternative_forward(x, w1_t, b1_r, w2_p, b2_p, *, tile_b=512):
    """x: (B, 784). Params are the output of prepare_params(). Returns (B, 10) f32."""
    B = x.shape[0]

    # 128-aligned batch tile:
    #  * no bigger than needed to cover B,
    #  * capped at tile_b,
    #  * for large B, capped at ~B/2 so the grid has >= 2 steps (v7x megacore).
    tb_cover = _round_up(max(B, 1), 128)
    tb_half = max(128, _round_up(pl.cdiv(max(B, 1), 2), 128))
    tb = min(tile_b, tb_cover, tb_half)

    x = jnp.asarray(x, jnp.float32)              # stays f32; bf16 cast happens in-kernel

    grid = (pl.cdiv(B, tb),)                     # partial last block masked by Pallas
    out = pl.pallas_call(
        _mlp_kernel,
        out_shape=jax.ShapeDtypeStruct((B, PAD_OUT), jnp.bfloat16),
        grid_spec=pltpu.PrefetchScalarGridSpec(
            num_scalar_prefetch=0,
            grid=grid,
            in_specs=[
                pl.BlockSpec((tb, IN_DIM), lambda i: (i, 0)),
                pl.BlockSpec((IN_DIM, HID_DIM), lambda i: (0, 0)),
                pl.BlockSpec((1, HID_DIM), lambda i: (0, 0)),
                pl.BlockSpec((HID_DIM, PAD_OUT), lambda i: (0, 0)),
                pl.BlockSpec((1, PAD_OUT), lambda i: (0, 0)),
            ],
            out_specs=pl.BlockSpec((tb, PAD_OUT), lambda i: (i, 0)),
        ),
        compiler_params=pltpu.CompilerParams(
            dimension_semantics=("parallel",),
        ),
    )(x, w1_t, b1_r, w2_p, b2_p)

    return out[:, :OUT_DIM].astype(jnp.float32)


def _init_params(key):
    """Deterministic init mimicking torch.nn.Linear default (U[-1/sqrt(fan_in), ...])."""
    k1, k2, k3, k4 = jax.random.split(key, 4)
    bound1 = 1.0 / jnp.sqrt(jnp.float32(IN_DIM))
    bound2 = 1.0 / jnp.sqrt(jnp.float32(HID_DIM))
    w1 = jax.random.uniform(k1, (HID_DIM, IN_DIM), jnp.float32, -bound1, bound1)
    b1 = jax.random.uniform(k2, (HID_DIM,), jnp.float32, -bound1, bound1)
    w2 = jax.random.uniform(k3, (OUT_DIM, HID_DIM), jnp.float32, -bound2, bound2)
    b2 = jax.random.uniform(k4, (OUT_DIM,), jnp.float32, -bound2, bound2)
    return w1, b1, w2, b2


if __name__ == "__main__":
    key = jax.random.PRNGKey(0)
    k_x, k_p = jax.random.split(key)

    B = 8  # small, non-128-divisible batch — kernel masks the partial block
    x = jax.random.normal(k_x, (B, IN_DIM), jnp.float32)
    w1, b1, w2, b2 = _init_params(k_p)

    params = prepare_params(w1, b1, w2, b2)
    out = network_alternative_forward(x, *params)
    out = jax.block_until_ready(out)

    # Reference in plain f32 JAX (same math as the PyTorch module).
    h_ref = jax.nn.sigmoid(x @ w1.T + b1)
    ref = jax.nn.softmax(h_ref @ w2.T + b2, axis=-1)

    assert out.shape == (B, OUT_DIM)
    # bf16 matmul inputs + bf16 output store relax parity vs the f32 reference.
    assert jnp.allclose(out, ref, atol=2e-2, rtol=2e-2), float(jnp.max(jnp.abs(out - ref)))
    # Normalization is exact in f32; only bf16 output rounding remains (~2e-3).
    assert jnp.allclose(jnp.sum(out, axis=-1), 1.0, atol=1e-2)

    print("KERNEL_OK")
</pallas_src>

<mosaic_0001>
module attributes {stable_mosaic.version = 11 : i64} {
  func.func @_mlp_kernel(%arg0: i32, %arg1: memref<128x784xf32, #tpu.memory_space<vmem>>, %arg2: memref<784x256xbf16, #tpu.memory_space<vmem>>, %arg3: memref<1x256xf32, #tpu.memory_space<vmem>>, %arg4: memref<256x128xbf16, #tpu.memory_space<vmem>>, %arg5: memref<1x128xf32, #tpu.memory_space<vmem>>, %arg6: memref<128x128xbf16, #tpu.memory_space<vmem>>) attributes {dimension_semantics = [#tpu.dimension_semantics<parallel>], iteration_bounds = array<i64: 1>, scalar_prefetch = 0 : i64, scratch_operands = 0 : i64, tpu.core_type = #tpu.core_type<tc>, window_params = [{transform_indices = @transform_0, window_bounds = array<i64: 128, 784>}, {pipeline_mode = #tpu.pipeline_mode<synchronous>, transform_indices = @transform_1, window_bounds = array<i64: 784, 256>}, {pipeline_mode = #tpu.pipeline_mode<synchronous>, transform_indices = @transform_2, window_bounds = array<i64: 1, 256>}, {pipeline_mode = #tpu.pipeline_mode<synchronous>, transform_indices = @transform_3, window_bounds = array<i64: 256, 128>}, {pipeline_mode = #tpu.pipeline_mode<synchronous>, transform_indices = @transform_4, window_bounds = array<i64: 1, 128>}, {transform_indices = @transform_5, window_bounds = array<i64: 128, 128>}]} {
    %c0 = arith.constant 0 : index
    %c0_0 = arith.constant 0 : index
    %0 = vector.load %arg1[%c0, %c0_0] : memref<128x784xf32, #tpu.memory_space<vmem>>, vector<128x784xf32>
    %1 = arith.truncf %0 : vector<128x784xf32> to vector<128x784xbf16>
    %c0_1 = arith.constant 0 : index
    %c0_2 = arith.constant 0 : index
    %2 = vector.load %arg2[%c0_1, %c0_2] : memref<784x256xbf16, #tpu.memory_space<vmem>>, vector<784x256xbf16>
    %cst = arith.constant dense<0.000000e+00> : vector<128x256xf32>
    %3 = tpu.matmul %1, %2, %cst {dimension_numbers = #tpu.dot_dimension_numbers<[1], [0], [0], [1], [0, 0, 1, 1], [], []>} : vector<128x784xbf16>, vector<784x256xbf16>, vector<128x256xf32> -> vector<128x256xf32>
    %c0_3 = arith.constant 0 : index
    %c0_4 = arith.constant 0 : index
    %4 = vector.load %arg3[%c0_3, %c0_4] : memref<1x256xf32, #tpu.memory_space<vmem>>, vector<1x256xf32>
    %5 = vector.broadcast %4 : vector<1x256xf32> to vector<128x256xf32>
    %6 = arith.addf %3, %5 : vector<128x256xf32>
    %cst_5 = arith.constant 5.000000e-01 : f32
    %7 = vector.broadcast %cst_5 : f32 to vector<128x256xf32>
    %8 = arith.mulf %7, %6 : vector<128x256xf32>
    %9 = math.tanh %8 : vector<128x256xf32>
    %cst_6 = arith.constant 1.000000e+00 : f32
    %10 = vector.broadcast %cst_6 : f32 to vector<128x256xf32>
    %11 = arith.addf %9, %10 : vector<128x256xf32>
    %cst_7 = arith.constant 5.000000e-01 : f32
    %12 = vector.broadcast %cst_7 : f32 to vector<128x256xf32>
    %13 = arith.mulf %12, %11 : vector<128x256xf32>
    %14 = arith.truncf %13 : vector<128x256xf32> to vector<128x256xbf16>
    %c0_8 = arith.constant 0 : index
    %c0_9 = arith.constant 0 : index
    %15 = vector.load %arg4[%c0_8, %c0_9] : memref<256x128xbf16, #tpu.memory_space<vmem>>, vector<256x128xbf16>
    %cst_10 = arith.constant dense<0.000000e+00> : vector<128x128xf32>
    %16 = tpu.matmul %14, %15, %cst_10 {dimension_numbers = #tpu.dot_dimension_numbers<[1], [0], [0], [1], [0, 0, 1, 1], [], []>} : vector<128x256xbf16>, vector<256x128xbf16>, vector<128x128xf32> -> vector<128x128xf32>
    %c0_11 = arith.constant 0 : index
    %c0_12 = arith.constant 0 : index
    %17 = vector.load %arg5[%c0_11, %c0_12] : memref<1x128xf32, #tpu.memory_space<vmem>>, vector<1x128xf32>
    %18 = vector.broadcast %17 : vector<1x128xf32> to vector<128x128xf32>
    %19 = arith.addf %16, %18 : vector<128x128xf32>
    %cst_13 = arith.constant dense<0xFF800000> : vector<128xf32>
    %20 = vector.multi_reduction <maximumf>, %19, %cst_13 [1] : vector<128x128xf32> to vector<128xf32>
    %21 = vector.shape_cast %20 : vector<128xf32> to vector<128x1xf32>
    %22 = vector.broadcast %21 : vector<128x1xf32> to vector<128x128xf32>
    %23 = arith.subf %19, %22 : vector<128x128xf32>
    %24 = math.exp %23 : vector<128x128xf32>
    %cst_14 = arith.constant dense<0.000000e+00> : vector<128xf32>
    %25 = vector.multi_reduction <add>, %24, %cst_14 [1] : vector<128x128xf32> to vector<128xf32>
    %26 = vector.shape_cast %25 : vector<128xf32> to vector<128x1xf32>
    %27 = vector.broadcast %26 : vector<128x1xf32> to vector<128x128xf32>
    %28 = arith.divf %24, %27 : vector<128x128xf32>
    %29 = arith.truncf %28 : vector<128x128xf32> to vector<128x128xbf16>
    %c0_15 = arith.constant 0 : index
    %c0_16 = arith.constant 0 : index
    %30 = vector.load %arg6[%c0_15, %c0_16] : memref<128x128xbf16, #tpu.memory_space<vmem>>, vector<128x128xbf16>
    tpu.vector_store %arg6[%c0_15, %c0_16], %29 {strides = array<i32>} : memref<128x128xbf16, #tpu.memory_space<vmem>>, vector<128x128xbf16>,
    return
  }
  func.func @transform_0(%arg0: i32) -> (i32, i32) {
    %c0_i32 = arith.constant 0 : i32
    %c0_i32_0 = arith.constant 0 : i32
    return %arg0, %c0_i32 : i32, i32
  }
  func.func @transform_1(%arg0: i32) -> (i32, i32) {
    %c0_i32 = arith.constant 0 : i32
    %c0_i32_0 = arith.constant 0 : i32
    %c0_i32_1 = arith.constant 0 : i32
    return %c0_i32, %c0_i32_0 : i32, i32
  }
  func.func @transform_2(%arg0: i32) -> (i32, i32) {
    %c0_i32 = arith.constant 0 : i32
    %c0_i32_0 = arith.constant 0 : i32
    %c0_i32_1 = arith.constant 0 : i32
    return %c0_i32, %c0_i32_0 : i32, i32
  }
  func.func @transform_3(%arg0: i32) -> (i32, i32) {
    %c0_i32 = arith.constant 0 : i32
    %c0_i32_0 = arith.constant 0 : i32
    %c0_i32_1 = arith.constant 0 : i32
    return %c0_i32, %c0_i32_0 : i32, i32
  }
  func.func @transform_4(%arg0: i32) -> (i32, i32) {
    %c0_i32 = arith.constant 0 : i32
    %c0_i32_0 = arith.constant 0 : i32
    %c0_i32_1 = arith.constant 0 : i32
    return %c0_i32, %c0_i32_0 : i32, i32
  }
  func.func @transform_5(%arg0: i32) -> (i32, i32) {
    %c0_i32 = arith.constant 0 : i32
    %c0_i32_0 = arith.constant 0 : i32
    return %arg0, %c0_i32 : i32, i32
  }
}

</mosaic_0001>

<bundles_post_ra>
// kernel: network_alternative_forward.1
= control target key start
LH: loop header
LB: loop body
LE: loop exit
PB: predicated region body
PF: predicated region fallthrough
CT: control target
= control target key end

     0   :  { %10 = vsyncpa [#allocation3], 0  ;;  %s3060_s0 = inlined_call_operand.hbm [shape: f32[8,784], index: 0, kind: input, shape index: {}]   ;;  %s3061_s1 = inlined_call_operand.hbm [shape: bf16[784,256], index: 1, kind: input, shape index: {}]   ;;  %s3062_s2 = inlined_call_operand.vmem [shape: f32[1,256], index: 2, kind: input, shape index: {}]   ;;  %s3063_s3 = inlined_call_operand.hbm [shape: bf16[256,128], index: 3, kind: input, shape index: {}]   ;;  %s3064_s4 = inlined_call_operand.vmem [shape: f32[1,128], index: 4, kind: input, shape index: {}]   ;;  %s3065_s5 = inlined_call_operand.vmem [shape: bf16[8,128], index: 5, kind: output, shape index: {}]  }
   0x1   :  { %11 = vsyncpa [#allocation5], 0 }
   0x2   :  { %16 = vsyncadd [#allocation3], 13440  ;;  %s2745_s18 = smov [#allocation4]   ;;  %s2675_s22 = scalar_lea.hbm %s3061_s1, 12544 }
   0x3   :  { %s29_s19 = sshll.u32 %s2745_s18, 4  ;;  %p2676_p0 = scmp.ne.s32.totalorder %s3061_s1, %s2675_s22  ;;  %s30_s19 = int_to_ptr.vmem [resolvable:$true] %s29_s19 }
   0x4   :  { %p2679_p1 = scmp.lt.u32.totalorder %s2675_s22, %s3061_s1 }
   0x6   :  { %p2681_p2 = pnand %p2679_p1, %p2676_p0 }
   0x8   :  { %2684 = shalt.err (!%p2681_p2)
}
   0x9   :  { %s2685_s27 = scalar_lea.vmem %s30_s19, 12544  ;;  %p2690_p4 = scmp.lt.s32.totalorder %s30_s19, %s30_s19 }
   0xa   :  { %p2686_p3 = scmp.ne.s32.totalorder %s30_s19, %s2685_s27  ;;  %p2691_p5 = scmp.lt.s32.totalorder %s2685_s27, %s2685_s27 }
   0xc   :  { %p2692_p6 = por %p2691_p5, %p2690_p4 }
   0xe   :  { %p2693_p7 = pnand %p2692_p6, %p2686_p3 }
  0x10   :  { %2696 = shalt.err (!%p2693_p7)
}
  0x11   :  { %s2746_s28 = smov 128   ;;  %s2747_s29 = smov 8  }
  0x12   :  { %35 = dma.hbm_to_vmem [thread:$0]  %s3061_s1, 12544, %s30_s19, [#allocation5], %s2746_s28, %s2746_s28, %s2747_s29  }
  0x13   :  { %s2748_s7 = smov [#allocation2]   ;;  %s2697_s11 = scalar_lea.hbm %s3060_s0, 896 }
  0x14   :  { %s17_s8 = sshll.u32 %s2748_s7, 4  ;;  %p2698_p8 = scmp.ne.s32.totalorder %s3060_s0, %s2697_s11  ;;  %s18_s8 = int_to_ptr.vmem [resolvable:$true] %s17_s8 }
  0x15   :  { %p2701_p9 = scmp.lt.u32.totalorder %s2697_s11, %s3060_s0 }
  0x17   :  { %p2703_p10 = pnand %p2701_p9, %p2698_p8 }
  0x19   :  { %2706 = shalt.err (!%p2703_p10)
}
  0x1a   :  { %s2707_s16 = scalar_lea.vmem %s18_s8, 896  ;;  %s2711_s1 = scalar_lea.vmem %s18_s8, 14336 }
  0x1b   :  { %p2708_p11 = scmp.ne.s32.totalorder %s18_s8, %s2707_s16  ;;  %p2712_p12 = scmp.lt.s32.totalorder %s18_s8, %s18_s8 }
  0x1c   :  { %p2713_p13 = scmp.lt.s32.totalorder %s2711_s1, %s2707_s16 }
  0x1e   :  { %p2714_p0 = por %p2713_p13, %p2712_p12 }
  0x20   :  { %p2715_p1 = pnand %p2714_p0, %p2708_p11 }
  0x22   :  { %2718 = shalt.err (!%p2715_p1)
}
  0x23   :  { %s2749_s17 = smov 896   ;;  %s2750_s18 = smov 56  }
  0x24   :  { %23 = dma.hbm_to_vmem [thread:$0]  %s3060_s0, 896, %s18_s8, [#allocation3], %s2749_s17, %s2749_s17, %s2750_s18  }
  0x25   :  { %s2751_s21 = smov [#allocation6]   ;;  %s2719_s25 = scalar_lea.hbm %s3063_s3, 2048 }
  0x26   :  { %s43_s22 = sshll.u32 %s2751_s21, 4  ;;  %p2720_p2 = scmp.ne.s32.totalorder %s3063_s3, %s2719_s25  ;;  %s44_s22 = int_to_ptr.vmem [resolvable:$true] %s43_s22 }
  0x27   :  { %p2723_p3 = scmp.lt.u32.totalorder %s2719_s25, %s3063_s3 }
  0x29   :  { %p2725_p4 = pnand %p2723_p3, %p2720_p2 }
  0x2b   :  { %2728 = shalt.err (!%p2725_p4)
}
  0x2c   :  { %s2729_s30 = scalar_lea.vmem %s44_s22, 2048  ;;  %p2734_p6 = scmp.lt.s32.totalorder %s44_s22, %s44_s22 }
  0x2d   :  { %p2730_p5 = scmp.ne.s32.totalorder %s44_s22, %s2729_s30  ;;  %p2735_p7 = scmp.lt.s32.totalorder %s2729_s30, %s2729_s30 }
  0x2f   :  { %p2736_p8 = por %p2735_p7, %p2734_p6 }
  0x31   :  { %p2737_p9 = pnand %p2736_p8, %p2730_p5 }
  0x33   :  { %2740 = shalt.err (!%p2737_p9)
}
  0x34   :  { %s2752_s0 = smov 64   ;;  %s2753_s6 = smov 4  }
  0x35   :  { %49 = dma.hbm_to_vmem [thread:$0]  %s3063_s3, 2048, %s44_s22, [#allocation5], %s2752_s0, %s2752_s0, %s2753_s6  }
  0x36   :  { %2741 = dma.done.wait [#allocation3], 14336  }
  0x37   :  { %2742 = vsyncadd [#allocation3], 4294952960 }
  0x38   :  { %2743 = dma.done.wait [#allocation5], 14592  }
  0x39   :  { %2744 = vsyncadd [#allocation5], 4294952704  ;;  %v2384_v0 = vld [vmem:[#allocation4 + $0x4] ss:$8 sps:$4 sm:$0xff]   ;;  %v2388_v2 = vld [vmem:[#allocation4] ss:$8 sps:$4 sm:$0xff]  }
  0x3a   :  { %v2386_v1 = vld [vmem:[#allocation4 + $0x104] ss:$8 sps:$4 sm:$0xff]   ;;  %855 = vmatprep.subr.bf16.mxu1 %v2384_v0  ;;  %v2389_v3 = vld [vmem:[#allocation4 + $0x100] ss:$8 sps:$4 sm:$0xff]   ;;  %v2390_v4 = vld [vmem:[#allocation4 + $0x14] ss:$8 sps:$4 sm:$0xff]  }
  0x3b   :  { %968 = vmatprep.subr.bf16.mxu0 %v2386_v1  ;;  %856 = vmatpush1.bf16.msra.mxu1 %v2388_v2  ;;  %v2392_v5 = vld [vmem:[#allocation4 + $0x114] ss:$8 sps:$4 sm:$0xff]   ;;  %v2394_v6 = vld [vmem:[#allocation4 + $0x10] ss:$8 sps:$4 sm:$0xff]   ;;  %v2396_v8 = vld [vmem:[#allocation4 + $0x24] ss:$8 sps:$4 sm:$0xff]  }
  0x3c   :  { %969 = vmatpush1.bf16.msra.mxu0 %v2389_v3  ;;  %857 = vmatprep.subr.bf16.mxu1 %v2390_v4  ;;  %v2395_v7 = vld [vmem:[#allocation4 + $0x110] ss:$8 sps:$4 sm:$0xff]   ;;  %v2398_v9 = vld [vmem:[#allocation4 + $0x124] ss:$8 sps:$4 sm:$0xff]   ;;  %v2400_v10 = vld [vmem:[#allocation4 + $0x20] ss:$8 sps:$4 sm:$0xff]  }
  0x3d   :  { %970 = vmatprep.subr.bf16.mxu0 %v2392_v5  ;;  %v2401_v11 = vld [vmem:[#allocation4 + $0x120] ss:$8 sps:$4 sm:$0xff]   ;;  %v2402_v12 = vld [vmem:[#allocation4 + $0x34] ss:$8 sps:$4 sm:$0xff]   ;;  %v2406_v14 = vld [vmem:[#allocation4 + $0x30] ss:$8 sps:$4 sm:$0xff]  }
  0x3e   :  { %v2404_v13 = vld [vmem:[#allocation4 + $0x134] ss:$8 sps:$4 sm:$0xff]   ;;  %v2407_v15 = vld [vmem:[#allocation4 + $0x130] ss:$8 sps:$4 sm:$0xff]   ;;  %v2408_v16 = vld [vmem:[#allocation4 + $0x44] ss:$8 sps:$4 sm:$0xff]  }
  0x3f   :  { %858 = vmatpush1.bf16.msra.mxu1 %v2394_v6  ;;  %v2410_v17 = vld [vmem:[#allocation4 + $0x144] ss:$8 sps:$4 sm:$0xff]   ;;  %v2412_v18 = vld [vmem:[#allocation4 + $0x40] ss:$8 sps:$4 sm:$0xff]   ;;  %v2414_v20 = vld [vmem:[#allocation4 + $0x54] ss:$8 sps:$4 sm:$0xff]  }
  0x40   :  { %971 = vmatpush1.bf16.msra.mxu0 %v2395_v7  ;;  %859 = vmatprep.subr.bf16.mxu1 %v2396_v8  ;;  %v2413_v19 = vld [vmem:[#allocation4 + $0x140] ss:$8 sps:$4 sm:$0xff]   ;;  %v2416_v21 = vld [vmem:[#allocation4 + $0x154] ss:$8 sps:$4 sm:$0xff]   ;;  %v2418_v22 = vld [vmem:[#allocation4 + $0x50] ss:$8 sps:$4 sm:$0xff]  }
  0x41   :  { %972 = vmatprep.subr.bf16.mxu0 %v2398_v9  ;;  %v2419_v23 = vld [vmem:[#allocation4 + $0x150] ss:$8 sps:$4 sm:$0xff]   ;;  %v2420_v24 = vld [vmem:[#allocation4 + $0x64] ss:$8 sps:$4 sm:$0xff]   ;;  %v2424_v26 = vld [vmem:[#allocation4 + $0x60] ss:$8 sps:$4 sm:$0xff]  }
  0x42   :  { %v2422_v25 = vld [vmem:[#allocation4 + $0x164] ss:$8 sps:$4 sm:$0xff]   ;;  %v2425_v27 = vld [vmem:[#allocation4 + $0x160] ss:$8 sps:$4 sm:$0xff]   ;;  %v2426_v28 = vld [vmem:[#allocation4 + $0x74] ss:$8 sps:$4 sm:$0xff]  }
  0x43   :  { %860 = vmatpush1.bf16.msra.mxu1 %v2400_v10  ;;  %v2428_v29 = vld [vmem:[#allocation4 + $0x174] ss:$8 sps:$4 sm:$0xff]   ;;  %v2430_v30 = vld [vmem:[#allocation4 + $0x70] ss:$8 sps:$4 sm:$0xff]   ;;  %v2432_v32 = vld [vmem:[#allocation4 + $0x84] ss:$8 sps:$4 sm:$0xff]  }
  0x44   :  { %973 = vmatpush1.bf16.msra.mxu0 %v2401_v11  ;;  %861 = vmatprep.subr.bf16.mxu1 %v2402_v12  ;;  %v2431_v31 = vld [vmem:[#allocation4 + $0x170] ss:$8 sps:$4 sm:$0xff]   ;;  %v2434_v33 = vld [vmem:[#allocation4 + $0x184] ss:$8 sps:$4 sm:$0xff]   ;;  %v2436_v34 = vld [vmem:[#allocation4 + $0x80] ss:$8 sps:$4 sm:$0xff]  }
  0x45   :  { %974 = vmatprep.subr.bf16.mxu0 %v2404_v13  ;;  %v2437_v35 = vld [vmem:[#allocation4 + $0x180] ss:$8 sps:$4 sm:$0xff]   ;;  %v2438_v36 = vld [vmem:[#allocation4 + $0x94] ss:$8 sps:$4 sm:$0xff]   ;;  %v2442_v38 = vld [vmem:[#allocation4 + $0x90] ss:$8 sps:$4 sm:$0xff]  }
  0x46   :  { %v2440_v37 = vld [vmem:[#allocation4 + $0x194] ss:$8 sps:$4 sm:$0xff]   ;;  %v2443_v39 = vld [vmem:[#allocation4 + $0x190] ss:$8 sps:$4 sm:$0xff]   ;;  %v2444_v40 = vld [vmem:[#allocation4 + $0xa4] ss:$8 sps:$4 sm:$0xff]  }
  0x47   :  { %862 = vmatpush1.bf16.msra.mxu1 %v2406_v14  ;;  %v2446_v41 = vld [vmem:[#allocation4 + $0x1a4] ss:$8 sps:$4 sm:$0xff]   ;;  %v2448_v42 = vld [vmem:[#allocation4 + $0xa0] ss:$8 sps:$4 sm:$0xff]   ;;  %v2450_v44 = vld [vmem:[#allocation4 + $0xb4] ss:$8 sps:$4 sm:$0xff]  }
  0x48   :  { %975 = vmatpush1.bf16.msra.mxu0 %v2407_v15  ;;  %863 = vmatprep.subr.bf16.mxu1 %v2408_v16  ;;  %v2449_v43 = vld [vmem:[#allocation4 + $0x1a0] ss:$8 sps:$4 sm:$0xff]   ;;  %v2452_v45 = vld [vmem:[#allocation4 + $0x1b4] ss:$8 sps:$4 sm:$0xff]   ;;  %v2454_v50 = vld [vmem:[#allocation4 + $0xb0] ss:$8 sps:$4 sm:$0xff]  }
  0x49   :  { %976 = vmatprep.subr.bf16.mxu0 %v2410_v17  ;;  %v63_v46 = vld [vmem:[#allocation2 + $0x8] sm:$0xff]  ;;  %v70_v47 = vld [vmem:[#allocation2 + $0x40] sm:$0xff]  ;;  %v65_v48 = vld [vmem:[#allocation2 + $0x18] sm:$0xff]  ;;  %vm830_vm0 = vcmask 130048  }
  0x4a   :  { %v72_v49 = vld [vmem:[#allocation2 + $0x50] sm:$0xff]  ;;  %v2456_v52 = vld [vmem:[#allocation4 + $0xc4] ss:$8 sps:$4 sm:$0xff]   ;;  %v175_v53 = vpack.c.bf16 %v70_v47, %v63_v46  ;;  %v2460_v56 = vld [vmem:[#allocation4 + $0xc0] ss:$8 sps:$4 sm:$0xff]  }
  0x4b   :  { %864 = vmatpush1.bf16.msra.mxu1 %v2412_v18  ;;  %v2455_v51 = vld [vmem:[#allocation4 + $0x1b0] ss:$8 sps:$4 sm:$0xff]   ;;  %v177_v54 = vpack.c.bf16 %v72_v49, %v65_v48  ;;  %v2458_v55 = vld [vmem:[#allocation4 + $0x1c4] ss:$8 sps:$4 sm:$0xff]   ;;  %v2461_v57 = vld [vmem:[#allocation4 + $0x1c0] ss:$8 sps:$4 sm:$0xff]  }
  0x4c   :  { %977 = vmatpush1.bf16.msra.mxu0 %v2413_v19  ;;  %865 = vmatprep.subr.bf16.mxu1 %v2414_v20  ;;  %v2462_v58 = vld [vmem:[#allocation4 + $0xd4] ss:$8 sps:$4 sm:$0xff]   ;;  %v2466_v60 = vld [vmem:[#allocation4 + $0xd0] ss:$8 sps:$4 sm:$0xff]   ;;  %v2468_v62 = vld [vmem:[#allocation4 + $0xe4] ss:$8 sps:$4 sm:$0xff]  }
  0x4d   :  { %978 = vmatprep.subr.bf16.mxu0 %v2416_v21  ;;  %887 = vmatprep.mubr.bf16.mxu1 %v175_v53  ;;  %v2464_v59 = vld [vmem:[#allocation4 + $0x1d4] ss:$8 sps:$4 sm:$0xff]   ;;  %v2467_v61 = vld [vmem:[#allocation4 + $0x1d0] ss:$8 sps:$4 sm:$0xff]   ;;  %v2470_v63 = vld [vmem:[#allocation4 + $0x1e4] ss:$8 sps:$4 sm:$0xff]  }
  0x4e   :  { %1000 = vmatprep.mubr.bf16.mxu0 %v177_v54  ;;  %v2472_v0 = vld [vmem:[#allocation4 + $0xe0] ss:$8 sps:$4 sm:$0xff]   ;;  %v2474_v2 = vld [vmem:[#allocation4 + $0xf4] ss:$8 sps:$4 sm:$0xff]   ;;  %v2478_v4 = vld [vmem:[#allocation4 + $0xf0] ss:$8 sps:$4 sm:$0xff]  }
  0x4f   :  { %866 = vmatpush1.bf16.msra.mxu1 %v2418_v22  ;;  %v2473_v1 = vld [vmem:[#allocation4 + $0x1e0] ss:$8 sps:$4 sm:$0xff]   ;;  %v2476_v3 = vld [vmem:[#allocation4 + $0x1f4] ss:$8 sps:$4 sm:$0xff]   ;;  %v2479_v5 = vld [vmem:[#allocation4 + $0x1f0] ss:$8 sps:$4 sm:$0xff]  }
  0x50   :  { %979 = vmatpush1.bf16.msra.mxu0 %v2419_v23  ;;  %867 = vmatprep.subr.bf16.mxu1 %v2420_v24  ;;  %v62_v6 = vld [vmem:[#allocation2] sm:$0xff]  ;;  %v69_v7 = vld [vmem:[#allocation2 + $0x38] sm:$0xff]  ;;  %v64_v8 = vld [vmem:[#allocation2 + $0x10] sm:$0xff] }
  0x51   :  { %980 = vmatprep.subr.bf16.mxu0 %v2422_v25  ;;  %v71_v9 = vld [vmem:[#allocation2 + $0x48] sm:$0xff]  ;;  %v77_v11 = vld [vmem:[#allocation2 + $0x78] sm:$0xff]  ;;  %v84_v12 = vld [vmem:[#allocation2 + $0xb0] sm:$0xff]  ;;  %v174_v13 = vpack.c.bf16 %v69_v7, %v62_v6 }
  0x52   :  { %v2482_v10 = vld [vmem:[#allocation4 + $0x204] ss:$8 sps:$4 sm:$0xff]   ;;  %v176_v14 = vpack.c.bf16 %v71_v9, %v64_v8  ;;  %v2480_v17 = vld [vmem:[#allocation4 + $0x200] ss:$8 sps:$4 sm:$0xff]   ;;  %v2485_v18 = vld [vmem:[#allocation4 + $0x214] ss:$8 sps:$4 sm:$0xff]   ;;  %v182_v20 = vpack.c.bf16 %v84_v12, %v77_v11 }
  0x53   :  { %868 = vmatpush1.bf16.msra.mxu1 %v2424_v26  ;;  %v79_v15 = vld [vmem:[#allocation2 + $0x88] sm:$0xff]  ;;  %v86_v16 = vld [vmem:[#allocation2 + $0xc0] sm:$0xff]  ;;  %v2483_v19 = vld [vmem:[#allocation4 + $0x210] ss:$8 sps:$4 sm:$0xff]  }
  0x54   :  { %981 = vmatpush1.bf16.msra.mxu0 %v2425_v27  ;;  %869 = vmatprep.subr.bf16.mxu1 %v2426_v28  ;;  %v184_v21 = vpack.c.bf16 %v86_v16, %v79_v15  ;;  %v76_v22 = vld [vmem:[#allocation2 + $0x70] sm:$0xff]  ;;  %v83_v23 = vld [vmem:[#allocation2 + $0xa8] sm:$0xff]  ;;  %v78_v24 = vld [vmem:[#allocation2 + $0x80] sm:$0xff] }
  0x55   :  { %982 = vmatprep.subr.bf16.mxu0 %v2428_v29  ;;  %v85_v25 = vld [vmem:[#allocation2 + $0xb8] sm:$0xff]  ;;  %v2488_v26 = vld [vmem:[#allocation4 + $0x224] ss:$8 sps:$4 sm:$0xff]   ;;  %v181_v28 = vpack.c.bf16 %v83_v23, %v76_v22  ;;  %v2492_v49 = vld [vmem:[#allocation4 + $0x240] ss:$8 sps:$4 sm:$0xff]  }
  0x56   :  { %v91_v27 = vld [vmem:[#allocation2 + $0xe8] sm:$0xff]  ;;  %v183_v29 = vpack.c.bf16 %v85_v25, %v78_v24  ;;  %v114_v48 = vld [vmem:[#allocation2 + $0x1a0] sm:$0xff]  ;;  %v104_v54 = vld [vmem:[#allocation2 + $0x150] sm:$0xff] }
  0x57   :  { %870 = vmatpush1.bf16.msra.mxu1 %v2430_v30  ;;  %v98_v30 = vld [vmem:[#allocation2 + $0x120] sm:$0xff]  ;;  %v107_v47 = vld [vmem:[#allocation2 + $0x168] sm:$0xff]  ;;  %v125_v7 = vld [vmem:[#allocation2 + $0x1f8] sm:$0xff] }
  0x58   :  { %983 = vmatpush1.bf16.msra.mxu0 %v2431_v31  ;;  %871 = vmatprep.subr.bf16.mxu1 %v2432_v32  ;;  %v93_v31 = vld [vmem:[#allocation2 + $0xf8] sm:$0xff]  ;;  %v100_v32 = vld [vmem:[#allocation2 + $0x130] sm:$0xff]  ;;  %v198_v53 = vpack.c.bf16 %v114_v48, %v107_v47  ;;  %v118_v6 = vld [vmem:[#allocation2 + $0x1c0] sm:$0xff] }
  0x59   :  { %984 = vmatprep.subr.bf16.mxu0 %v2434_v33  ;;  %v2486_v33 = vld [vmem:[#allocation4 + $0x220] ss:$8 sps:$4 sm:$0xff]   ;;  %v120_v8 = vld [vmem:[#allocation2 + $0x1d0] sm:$0xff]  ;;  %v133_v11 = vld [vmem:[#allocation2 + $0x238] sm:$0xff]  ;;  %v202_v12 = vpack.c.bf16 %v125_v7, %v118_v6 }
  0x5a   :  { %v127_v9 = vld [vmem:[#allocation2 + $0x208] sm:$0xff]  ;;  %v142_v16 = vld [vmem:[#allocation2 + $0x280] sm:$0xff]  ;;  %v132_v22 = vld [vmem:[#allocation2 + $0x230] sm:$0xff] }
  0x5b   :  { %872 = vmatpush1.bf16.msra.mxu1 %v2436_v34  ;;  %v2491_v34 = vld [vmem:[#allocation4 + $0x234] ss:$8 sps:$4 sm:$0xff]   ;;  %v135_v15 = vld [vmem:[#allocation2 + $0x248] sm:$0xff]  ;;  %v134_v24 = vld [vmem:[#allocation2 + $0x240] sm:$0xff] }
  0x5c   :  { %985 = vmatpush1.bf16.msra.mxu0 %v2437_v35  ;;  %873 = vmatprep.subr.bf16.mxu1 %v2438_v36  ;;  %v189_v35 = vpack.c.bf16 %v98_v30, %v91_v27  ;;  %v191_v36 = vpack.c.bf16 %v100_v32, %v93_v31  ;;  %v139_v23 = vld [vmem:[#allocation2 + $0x268] sm:$0xff]  ;;  %v141_v25 = vld [vmem:[#allocation2 + $0x278] sm:$0xff]  ;;  %v156_v31 = vld [vmem:[#allocation2 + $0x2f0] sm:$0xff] }
  0x5d   :  { %986 = vmatprep.subr.bf16.mxu0 %v2440_v37  ;;  %v2489_v37 = vld [vmem:[#allocation4 + $0x230] ss:$8 sps:$4 sm:$0xff]   ;;  %v147_v27 = vld [vmem:[#allocation2 + $0x2a8] sm:$0xff]  ;;  %v209_v32 = vpack.c.bf16 %v139_v23, %v132_v22  ;;  %v66_v6 = vld [vmem:[#allocation2 + $0x20] sm:$0xff] }
  0x5e   :  { %v149_v30 = vld [vmem:[#allocation2 + $0x2b8] sm:$0xff]  ;;  %v2516_v47 = vld [vmem:[#allocation4 + $0x2c0] ss:$8 sps:$4 sm:$0xff]   ;;  %v136_v22 = vld [vmem:[#allocation2 + $0x250] sm:$0xff] }
  0x5f   :  { %874 = vmatpush1.bf16.msra.mxu1 %v2442_v38  ;;  %v90_v38 = vld [vmem:[#allocation2 + $0xe0] sm:$0xff]  ;;  %v73_v7 = vld [vmem:[#allocation2 + $0x58] sm:$0xff]  ;;  %v143_v23 = vld [vmem:[#allocation2 + $0x288] sm:$0xff] }
  0x60   :  { %987 = vmatpush1.bf16.msra.mxu0 %v2443_v39  ;;  %875 = vmatprep.subr.bf16.mxu1 %v2444_v40  ;;  %v97_v39 = vld [vmem:[#allocation2 + $0x118] sm:$0xff]  ;;  %v92_v40 = vld [vmem:[#allocation2 + $0xf0] sm:$0xff] }
  0x61   :  { %988 = vmatprep.subr.bf16.mxu0 %v2446_v41  ;;  %v99_v41 = vld [vmem:[#allocation2 + $0x128] sm:$0xff] }
  0x62   :  { %v190_v46 = vpack.c.bf16 %v99_v41, %v92_v40  ;;  %v148_v40 = vld [vmem:[#allocation2 + $0x2b0] sm:$0xff]  ;;  %v155_v41 = vld [vmem:[#allocation2 + $0x2e8] sm:$0xff] }
  0x63   :  { %876 = vmatpush1.bf16.msra.mxu1 %v2448_v42  ;;  %v2494_v42 = vld [vmem:[#allocation4 + $0x244] ss:$8 sps:$4 sm:$0xff]  }
  0x64   :  { %989 = vmatpush1.bf16.msra.mxu0 %v2449_v43  ;;  %877 = vmatprep.subr.bf16.mxu1 %v2450_v44  ;;  %v105_v43 = vld [vmem:[#allocation2 + $0x158] sm:$0xff]  ;;  %v112_v44 = vld [vmem:[#allocation2 + $0x190] sm:$0xff] }
  0x65   :  { %990 = vmatprep.subr.bf16.mxu0 %v2452_v45  ;;  %v188_v45 = vpack.c.bf16 %v97_v39, %v90_v38  ;;  %v146_v38 = vld [vmem:[#allocation2 + $0x2a0] sm:$0xff]  ;;  %v153_v39 = vld [vmem:[#allocation2 + $0x2d8] sm:$0xff] }
  0x66   :  { %v216_v48 = vpack.c.bf16 %v153_v39, %v146_v38  ;;  %v165_v38 = vld [vmem:[#allocation2 + $0x338] sm:$0xff]  ;;  %v172_v39 = vld [vmem:[#allocation2 + $0x370] sm:$0xff] }
  0x67   :  { %878 = vmatpush1.bf16.msra.mxu1 %v2454_v50  ;;  %v2497_v50 = vld [vmem:[#allocation4 + $0x254] ss:$8 sps:$4 sm:$0xff]  }
  0x68   :  { %991 = vmatpush1.bf16.msra.mxu0 %v2455_v51  ;;  %879 = vmatprep.subr.bf16.mxu1 %v2456_v52  ;;  %v2495_v51 = vld [vmem:[#allocation4 + $0x250] ss:$8 sps:$4 sm:$0xff]   ;;  %v196_v52 = vpack.c.bf16 %v112_v44, %v105_v43 }
  0x69   :  { %992 = vmatprep.subr.bf16.mxu0 %v2458_v55  ;;  %v111_v55 = vld [vmem:[#allocation2 + $0x188] sm:$0xff]  ;;  %v161_v43 = vld [vmem:[#allocation2 + $0x318] sm:$0xff]  ;;  %v168_v44 = vld [vmem:[#allocation2 + $0x350] sm:$0xff] }
  0x6b   :  { %880 = vmatpush1.bf16.msra.mxu1 %v2460_v56  ;;  %v106_v56 = vld [vmem:[#allocation2 + $0x160] sm:$0xff] }
  0x6c   :  { %993 = vmatpush1.bf16.msra.mxu0 %v2461_v57  ;;  %881 = vmatprep.subr.bf16.mxu1 %v2462_v58  ;;  %v113_v57 = vld [vmem:[#allocation2 + $0x198] sm:$0xff]  ;;  %v2500_v58 = vld [vmem:[#allocation4 + $0x264] ss:$8 sps:$4 sm:$0xff]  }
  0x6d   :  { %994 = vmatprep.subr.bf16.mxu0 %v2464_v59  ;;  %v119_v59 = vld [vmem:[#allocation2 + $0x1c8] sm:$0xff] }
  0x6f   :  { %882 = vmatpush1.bf16.msra.mxu1 %v2466_v60  ;;  %v195_v60 = vpack.c.bf16 %v111_v55, %v104_v54  ;;  %v160_v54 = vld [vmem:[#allocation2 + $0x310] sm:$0xff]  ;;  %v167_v55 = vld [vmem:[#allocation2 + $0x348] sm:$0xff] }
  0x70   :  { %995 = vmatpush1.bf16.msra.mxu0 %v2467_v61  ;;  %883 = vmatprep.subr.bf16.mxu1 %v2468_v62  ;;  %v197_v61 = vpack.c.bf16 %v113_v57, %v106_v56  ;;  %v126_v62 = vld [vmem:[#allocation2 + $0x200] sm:$0xff]  ;;  %v169_v57 = vld [vmem:[#allocation2 + $0x358] sm:$0xff] }
  0x71   :  { %996 = vmatprep.subr.bf16.mxu0 %v2470_v63  ;;  %v121_v63 = vld [vmem:[#allocation2 + $0x1d8] sm:$0xff]  ;;  %v162_v56 = vld [vmem:[#allocation2 + $0x320] sm:$0xff] }
  0x73   :  { %884 = vmatpush1.bf16.msra.mxu1 %v2472_v0  ;;  %v128_v0 = vld [vmem:[#allocation2 + $0x210] sm:$0xff] }
  0x74   :  { %997 = vmatpush1.bf16.msra.mxu0 %v2473_v1  ;;  %885 = vmatprep.subr.bf16.mxu1 %v2474_v2  ;;  %v2498_v1 = vld [vmem:[#allocation4 + $0x260] ss:$8 sps:$4 sm:$0xff]   ;;  %v2503_v2 = vld [vmem:[#allocation4 + $0x274] ss:$8 sps:$4 sm:$0xff]  }
  0x75   :  { %998 = vmatprep.subr.bf16.mxu0 %v2476_v3  ;;  %v203_v3 = vpack.c.bf16 %v126_v62, %v119_v59  ;;  %v67_v59 = vld [vmem:[#allocation2 + $0x28] sm:$0xff]  ;;  %v74_v62 = vld [vmem:[#allocation2 + $0x60] sm:$0xff] }
  0x77   :  { %886 = vmatpush1.bf16.msra.mxu1 %v2478_v4  ;;  %v205_v4 = vpack.c.bf16 %v128_v0, %v121_v63  ;;  %v123_v63 = vld [vmem:[#allocation2 + $0x1e8] sm:$0xff]  ;;  %v130_v0 = vld [vmem:[#allocation2 + $0x220] sm:$0xff] }
  0x78   :  { %999 = vmatpush1.bf16.msra.mxu0 %v2479_v5  ;;  %2214 = vmatprep.subr.bf16.mxu1 %v2482_v10  ;;  %v2501_v5 = vld [vmem:[#allocation4 + $0x270] ss:$8 sps:$4 sm:$0xff]  }
  0x79   :  { %1081 = vmatprep.subr.bf16.mxu0 %v2482_v10  ;;  %v2506_v10 = vld [vmem:[#allocation4 + $0x284] ss:$8 sps:$4 sm:$0xff]  }
  0x7a   :  { %888 = vmatmul.mubr.bf16.vlgmr.msra.gmra.mrb[0].mxu1 %v174_v13  ;;  %v204_v13 = vpack.c.bf16 %v127_v9, %v120_v8  ;;  %v122_v8 = vld [vmem:[#allocation2 + $0x1e0] sm:$0xff]  ;;  %v129_v9 = vld [vmem:[#allocation2 + $0x218] sm:$0xff] }
  0x7b   :  { %1001 = vmatmul.mubr.bf16.vlgmr.msra.gmra.mrb[0].mxu0 %v176_v14  ;;  %2230 = vmatpush1.bf16.msra.mxu1 %v2480_v17  ;;  %v140_v14 = vld [vmem:[#allocation2 + $0x270] sm:$0xff] }
  0x7c   :  { %1082 = vmatpush1.bf16.msra.mxu0 %v2480_v17  ;;  %2215 = vmatprep.subr.bf16.mxu1 %v2485_v18  ;;  %v2504_v17 = vld [vmem:[#allocation4 + $0x280] ss:$8 sps:$4 sm:$0xff]  }
  0x7d   :  { %1083 = vmatprep.subr.bf16.mxu0 %v2485_v18  ;;  %897 = vmatprep.mubr.bf16.mxu1 %v182_v20  ;;  %v2509_v18 = vld [vmem:[#allocation4 + $0x294] ss:$8 sps:$4 sm:$0xff]   ;;  %v212_v20 = vpack.c.bf16 %v142_v16, %v135_v15  ;;  %v178_v15 = vpack.c.bf16 %v73_v7, %v66_v6  ;;  %v206_v16 = vpack.c.bf16 %v129_v9, %v122_v8  ;;  %v159_v6 = vld [vmem:[#allocation2 + $0x308] sm:$0xff]  ;;  %v166_v8 = vld [vmem:[#allocation2 + $0x340] sm:$0xff] }
  0x7e   :  { %1010 = vmatprep.mubr.bf16.mxu0 %v184_v21  ;;  %v2507_v21 = vld [vmem:[#allocation4 + $0x290] ss:$8 sps:$4 sm:$0xff]  }
  0x7f   :  { %2231 = vmatpush1.bf16.msra.mxu1 %v2483_v19  ;;  %v173_v9 = vld [vmem:[#allocation2 + $0x378] sm:$0xff] }
  0x80   :  { %1084 = vmatpush1.bf16.msra.mxu0 %v2483_v19  ;;  %2216 = vmatprep.subr.bf16.mxu1 %v2488_v26  ;;  %v210_v19 = vpack.c.bf16 %v140_v14, %v133_v11  ;;  %v81_v11 = vld [vmem:[#allocation2 + $0x98] sm:$0xff]  ;;  %v144_v14 = vld [vmem:[#allocation2 + $0x290] sm:$0xff] }
  0x81   :  { %1085 = vmatprep.subr.bf16.mxu0 %v2488_v26  ;;  %v2512_v26 = vld [vmem:[#allocation4 + $0x2a4] ss:$8 sps:$4 sm:$0xff]  }
  0x82   :  { %898 = vmatmul.mubr.bf16.gmra.mrb[4].mxu1 %v181_v28  ;;  %v2510_v28 = vld [vmem:[#allocation4 + $0x2a0] ss:$8 sps:$4 sm:$0xff]  }
  0x83   :  { %1011 = vmatmul.mubr.bf16.gmra.mrb[4].mxu0 %v183_v29  ;;  %2232 = vmatpush1.bf16.msra.mxu1 %v2486_v33  ;;  %v154_v29 = vld [vmem:[#allocation2 + $0x2e0] sm:$0xff] }
  0x84   :  { %1086 = vmatpush1.bf16.msra.mxu0 %v2486_v33  ;;  %2217 = vmatprep.subr.bf16.mxu1 %v2491_v34  ;;  %v211_v33 = vpack.c.bf16 %v141_v25, %v134_v24  ;;  %v95_v24 = vld [vmem:[#allocation2 + $0x108] sm:$0xff]  ;;  %v102_v25 = vld [vmem:[#allocation2 + $0x140] sm:$0xff] }
  0x85   :  { %1087 = vmatprep.subr.bf16.mxu0 %v2491_v34  ;;  %907 = vmatprep.mubr.bf16.mxu1 %v189_v35  ;;  %v2515_v34 = vld [vmem:[#allocation4 + $0x2b4] ss:$8 sps:$4 sm:$0xff]   ;;  %v2513_v35 = vld [vmem:[#allocation4 + $0x2b0] ss:$8 sps:$4 sm:$0xff]  }
  0x86   :  { %1020 = vmatprep.mubr.bf16.mxu0 %v191_v36  ;;  %v217_v36 = vpack.c.bf16 %v154_v29, %v147_v27  ;;  %v158_v27 = vld [vmem:[#allocation2 + $0x300] sm:$0xff]  ;;  %v213_v29 = vpack.c.bf16 %v143_v23, %v136_v22  ;;  %v2542_v22 = vld [vmem:[#allocation6 + $0x28] sm:$0xff]  }
  0x87   :  { %2233 = vmatpush1.bf16.msra.mxu1 %v2489_v37  ;;  %v2543_v23 = vld [vmem:[#allocation6 + $0x70] sm:$0xff]  }
  0x88   :  { %1088 = vmatpush1.bf16.msra.mxu0 %v2489_v37  ;;  %2218 = vmatprep.subr.bf16.mxu1 %v2494_v42  ;;  %v219_v37 = vpack.c.bf16 %v156_v31, %v149_v30  ;;  %v193_v30 = vpack.c.bf16 %v102_v25, %v95_v24  ;;  %v2544_v24 = vld [vmem:[#allocation6 + $0x30] sm:$0xff]   ;;  %v2545_v25 = vld [vmem:[#allocation6 + $0x78] sm:$0xff]  }
  0x89   :  { %1089 = vmatprep.subr.bf16.mxu0 %v2494_v42  ;;  %v2518_v42 = vld [vmem:[#allocation4 + $0x2c4] ss:$8 sps:$4 sm:$0xff]  }
  0x8a   :  { %908 = vmatmul.mubr.bf16.gmra.mrb[8].mxu1 %v188_v45  ;;  %v163_v45 = vld [vmem:[#allocation2 + $0x328] sm:$0xff] }
  0x8b   :  { %1021 = vmatmul.mubr.bf16.gmra.mrb[8].mxu0 %v190_v46  ;;  %2234 = vmatpush1.bf16.msra.mxu1 %v2492_v49  ;;  %v170_v46 = vld [vmem:[#allocation2 + $0x360] sm:$0xff] }
  0x8c   :  { %1090 = vmatpush1.bf16.msra.mxu0 %v2492_v49  ;;  %2219 = vmatprep.subr.bf16.mxu1 %v2497_v50  ;;  %v218_v49 = vpack.c.bf16 %v155_v41, %v148_v40 }
  0x8d   :  { %1091 = vmatprep.subr.bf16.mxu0 %v2497_v50  ;;  %917 = vmatprep.mubr.bf16.mxu1 %v196_v52  ;;  %v2521_v50 = vld [vmem:[#allocation4 + $0x2d4] ss:$8 sps:$4 sm:$0xff]   ;;  %v226_v52 = vpack.c.bf16 %v170_v46, %v163_v45  ;;  %v115_v45 = vld [vmem:[#allocation2 + $0x1a8] sm:$0xff] }
  0x8e   :  { %1030 = vmatprep.mubr.bf16.mxu0 %v198_v53  ;;  %v2519_v53 = vld [vmem:[#allocation4 + $0x2d0] ss:$8 sps:$4 sm:$0xff]  }
  0x8f   :  { %2235 = vmatpush1.bf16.msra.mxu1 %v2495_v51  ;;  %v164_v46 = vld [vmem:[#allocation2 + $0x330] sm:$0xff] }
  0x90   :  { %1092 = vmatpush1.bf16.msra.mxu0 %v2495_v51  ;;  %2220 = vmatprep.subr.bf16.mxu1 %v2500_v58  ;;  %v224_v51 = vpack.c.bf16 %v168_v44, %v161_v43  ;;  %v228_v43 = vpack.c.bf16 %v172_v39, %v165_v38  ;;  %v108_v44 = vld [vmem:[#allocation2 + $0x170] sm:$0xff] }
  0x91   :  { %1093 = vmatprep.subr.bf16.mxu0 %v2500_v58  ;;  %v2524_v58 = vld [vmem:[#allocation4 + $0x2e4] ss:$8 sps:$4 sm:$0xff]  }
  0x92   :  { %918 = vmatmul.mubr.bf16.gmra.mrb[12].mxu1 %v195_v60  ;;  %v223_v60 = vpack.c.bf16 %v167_v55, %v160_v54  ;;  %v82_v54 = vld [vmem:[#allocation2 + $0xa0] sm:$0xff]  ;;  %v89_v55 = vld [vmem:[#allocation2 + $0xd8] sm:$0xff] }
  0x93   :  { %1031 = vmatmul.mubr.bf16.gmra.mrb[12].mxu0 %v197_v61  ;;  %2236 = vmatpush1.bf16.msra.mxu1 %v2498_v1  ;;  %v225_v61 = vpack.c.bf16 %v169_v57, %v162_v56  ;;  %v187_v56 = vpack.c.bf16 %v89_v55, %v82_v54  ;;  %v96_v57 = vld [vmem:[#allocation2 + $0x110] sm:$0xff] }
  0x94   :  { %1094 = vmatpush1.bf16.msra.mxu0 %v2498_v1  ;;  %2221 = vmatprep.subr.bf16.mxu1 %v2503_v2  ;;  %v2522_v1 = vld [vmem:[#allocation4 + $0x2e0] ss:$8 sps:$4 sm:$0xff]  }
  0x95   :  { %1095 = vmatprep.subr.bf16.mxu0 %v2503_v2  ;;  %927 = vmatprep.mubr.bf16.mxu1 %v203_v3  ;;  %v2527_v2 = vld [vmem:[#allocation4 + $0x2f4] ss:$8 sps:$4 sm:$0xff]   ;;  %v179_v3 = vpack.c.bf16 %v74_v62, %v67_v59 }
  0x96   :  { %1040 = vmatprep.mubr.bf16.mxu0 %v205_v4  ;;  %v207_v4 = vpack.c.bf16 %v130_v0, %v123_v63  ;;  %v124_v63 = vld [vmem:[#allocation2 + $0x1f0] sm:$0xff]  ;;  %v131_v0 = vld [vmem:[#allocation2 + $0x228] sm:$0xff] }
  0x97   :  { %2237 = vmatpush1.bf16.msra.mxu1 %v2501_v5 }
  0x98   :  { %1096 = vmatpush1.bf16.msra.mxu0 %v2501_v5  ;;  %2222 = vmatprep.subr.bf16.mxu1 %v2506_v10  ;;  %v2525_v5 = vld [vmem:[#allocation4 + $0x2f0] ss:$8 sps:$4 sm:$0xff]  }
  0x99   :  { %1097 = vmatprep.subr.bf16.mxu0 %v2506_v10  ;;  %v2530_v10 = vld [vmem:[#allocation4 + $0x304] ss:$8 sps:$4 sm:$0xff]  }
  0x9a   :  { %928 = vmatmul.mubr.bf16.gmra.mrb[16].mxu1 %v202_v12  ;;  %v88_v12 = vld [vmem:[#allocation2 + $0xd0] sm:$0xff] }
  0x9b   :  { %1041 = vmatmul.mubr.bf16.gmra.mrb[16].mxu0 %v204_v13  ;;  %2238 = vmatpush1.bf16.msra.mxu1 %v2504_v17  ;;  %v137_v13 = vld [vmem:[#allocation2 + $0x258] sm:$0xff] }
  0x9c   :  { %1098 = vmatpush1.bf16.msra.mxu0 %v2504_v17  ;;  %2223 = vmatprep.subr.bf16.mxu1 %v2509_v18  ;;  %v2528_v17 = vld [vmem:[#allocation4 + $0x300] ss:$8 sps:$4 sm:$0xff]  }
  0x9d   :  { %1099 = vmatprep.subr.bf16.mxu0 %v2509_v18  ;;  %937 = vmatprep.mubr.bf16.mxu1 %v210_v19  ;;  %v186_v18 = vpack.c.bf16 %v88_v12, %v81_v11  ;;  %v214_v19 = vpack.c.bf16 %v144_v14, %v137_v13  ;;  %v2531_v11 = vld [vmem:[#allocation6 + $0x40] sm:$0xff]   ;;  %v2533_v13 = vld [vmem:[#allocation6 + $0x48] sm:$0xff]  }
  0x9e   :  { %1050 = vmatprep.mubr.bf16.mxu0 %v212_v20  ;;  %v80_v20 = vld [vmem:[#allocation2 + $0x90] sm:$0xff]  ;;  %v2534_v14 = vld [vmem:[#allocation6 + $0x8] sm:$0xff]  }
  0x9f   :  { %2239 = vmatpush1.bf16.msra.mxu1 %v2507_v21  ;;  %v2532_v12 = vld [vmem:[#allocation6] sm:$0xff]  }
  0xa0   :  { %1100 = vmatpush1.bf16.msra.mxu0 %v2507_v21  ;;  %2224 = vmatprep.subr.bf16.mxu1 %v2512_v26  ;;  %v87_v21 = vld [vmem:[#allocation2 + $0xc8] sm:$0xff] }
  0xa1   :  { %1101 = vmatprep.subr.bf16.mxu0 %v2512_v26  ;;  %v151_v26 = vld [vmem:[#allocation2 + $0x2c8] sm:$0xff] }
  0xa2   :  { %938 = vmatmul.mubr.bf16.gmra.mrb[20].mxu1 %v209_v32  ;;  %v221_v31 = vpack.c.bf16 %v158_v27, %v151_v26  ;;  %v94_v32 = vld [vmem:[#allocation2 + $0x100] sm:$0xff]  ;;  %v2546_v26 = vld [vmem:[#allocation6 + $0x38] sm:$0xff]  }
  0xa3   :  { %1051 = vmatmul.mubr.bf16.gmra.mrb[20].mxu0 %v211_v33  ;;  %2240 = vmatpush1.bf16.msra.mxu1 %v2510_v28  ;;  %v101_v33 = vld [vmem:[#allocation2 + $0x138] sm:$0xff] }
  0xa4   :  { %1102 = vmatpush1.bf16.msra.mxu0 %v2510_v28  ;;  %2225 = vmatprep.subr.bf16.mxu1 %v2515_v34  ;;  %v185_v28 = vpack.c.bf16 %v87_v21, %v80_v20  ;;  %v192_v40 = vpack.c.bf16 %v101_v33, %v94_v32  ;;  %v2540_v20 = vld [vmem:[#allocation6 + $0x20] sm:$0xff]   ;;  %v2541_v21 = vld [vmem:[#allocation6 + $0x68] sm:$0xff]  }
  0xa5   :  { %1103 = vmatprep.subr.bf16.mxu0 %v2515_v34  ;;  %947 = vmatprep.mubr.bf16.mxu1 %v217_v36  ;;  %v150_v34 = vld [vmem:[#allocation2 + $0x2c0] sm:$0xff]  ;;  %v109_v36 = vld [vmem:[#allocation2 + $0x178] sm:$0xff] }
  0xa6   :  { %1060 = vmatprep.mubr.bf16.mxu0 %v219_v37  ;;  %v116_v37 = vld [vmem:[#allocation2 + $0x1b0] sm:$0xff] }
  0xa7   :  { %2241 = vmatpush1.bf16.msra.mxu1 %v2513_v35 }
  0xa8   :  { %1104 = vmatpush1.bf16.msra.mxu0 %v2513_v35  ;;  %2226 = vmatprep.subr.bf16.mxu1 %v2518_v42  ;;  %v157_v35 = vld [vmem:[#allocation2 + $0x2f8] sm:$0xff] }
  0xa9   :  { %1105 = vmatprep.subr.bf16.mxu0 %v2518_v42  ;;  %v220_v41 = vpack.c.bf16 %v157_v35, %v150_v34  ;;  %v200_v42 = vpack.c.bf16 %v116_v37, %v109_v36  ;;  %v330_v36 = vlaneseq }
  0xaa   :  { %948 = vmatmul.mubr.bf16.gmra.mrb[24].mxu1 %v216_v48  ;;  %v199_v48 = vpack.c.bf16 %v115_v45, %v108_v44  ;;  %v328_v44 = vld [vmem:[%s3062_s2] sm:$0x3] }
  0xab   :  { %1061 = vmatmul.mubr.bf16.gmra.mrb[24].mxu0 %v218_v49  ;;  %2242 = vmatpush1.bf16.msra.mxu1 %v2516_v47 }
  0xac   :  { %1106 = vmatpush1.bf16.msra.mxu0 %v2516_v47  ;;  %2227 = vmatprep.subr.bf16.mxu1 %v2521_v50  ;;  %v171_v47 = vld [vmem:[#allocation2 + $0x368] sm:$0xff] }
  0xad   :  { %1107 = vmatprep.subr.bf16.mxu0 %v2521_v50  ;;  %957 = vmatprep.mubr.bf16.mxu1 %v224_v51  ;;  %v227_v49 = vpack.c.bf16 %v171_v47, %v164_v46  ;;  %v2754_v50 = vmov 0   ;;  %v68_v51 = vld [vmem:[#allocation2 + $0x30] sm:$0xff] }
  0xae   :  { %1070 = vmatprep.mubr.bf16.mxu0 %v226_v52  ;;  %v75_v52 = vld [vmem:[#allocation2 + $0x68] sm:$0xff] }
  0xaf   :  { %2243 = vmatpush1.bf16.msra.mxu1 %v2519_v53 }
  0xb0   :  { %1108 = vmatpush1.bf16.msra.mxu0 %v2519_v53  ;;  %2228 = vmatprep.subr.bf16.mxu1 %v2524_v58  ;;  %v180_v53 = vpack.c.bf16 %v75_v52, %v68_v51 }
  0xb1   :  { %1109 = vmatprep.subr.bf16.mxu0 %v2524_v58  ;;  %v103_v58 = vld [vmem:[#allocation2 + $0x148] sm:$0xff] }
  0xb2   :  { %958 = vmatmul.mubr.bf16.gmra.mrb[28].mxu1 %v223_v60  ;;  %v194_v59 = vpack.c.bf16 %v103_v58, %v96_v57  ;;  %v110_v60 = vld [vmem:[#allocation2 + $0x180] sm:$0xff] }
  0xb3   :  { %1071 = vmatmul.mubr.bf16.gmra.mrb[28].mxu0 %v225_v61  ;;  %2244 = vmatpush1.bf16.msra.mxu1 %v2522_v1  ;;  %v117_v61 = vld [vmem:[#allocation2 + $0x1b8] sm:$0xff] }
  0xb4   :  { %1110 = vmatpush1.bf16.msra.mxu0 %v2522_v1  ;;  %2229 = vmatprep.subr.bf16.mxu1 %v2527_v2  ;;  %v201_v62 = vpack.c.bf16 %v117_v61, %v110_v60  ;;  %v208_v1 = vpack.c.bf16 %v131_v0, %v124_v63 }
  0xb5   :  { %1111 = vmatprep.subr.bf16.mxu0 %v2527_v2  ;;  %1113 = vmatprep.mubr.bf16.mxu0 %v179_v3  ;;  %v138_v2 = vld [vmem:[#allocation2 + $0x260] sm:$0xff]  ;;  %v145_v3 = vld [vmem:[#allocation2 + $0x298] sm:$0xff] }
  0xb6   :  { %1153 = vmatprep.mubr.bf16.mxu1 %v207_v4  ;;  %v215_v4 = vpack.c.bf16 %v145_v3, %v138_v2 }
  0xb7   :  { %2245 = vmatpush1.bf16.msra.mxu1 %v2525_v5 }
  0xb8   :  { %1112 = vmatpush1.bf16.msra.mxu0 %v2525_v5  ;;  %v152_v5 = vld [vmem:[#allocation2 + $0x2d0] sm:$0xff]  ;;  %2150 = vmatprep.subr.bf16.mxu1 %v2531_v11 }
  0xb9   :  { %1194 = vmatprep.subr.bf16.mxu0 %v2530_v10  ;;  %v222_v7 = vpack.c.bf16 %v159_v6, %v152_v5  ;;  %v229_v10 = vpack.c.bf16 %v173_v9, %v166_v8 }
  0xba   :  { %1154 = vmatmul.mubr.bf16.vlgmr.msra.gmra.mrb[32].mxu1 %v206_v16  ;;  %v2536_v16 = vld [vmem:[#allocation6 + $0x10] sm:$0xff]  }
  0xbb   :  { %1114 = vmatmul.mubr.bf16.vlgmr.msra.gmra.mrb[0].mxu0 %v178_v15  ;;  %1163 = vmatprep.mubr.bf16.mxu1 %v214_v19  ;;  %v2535_v15 = vld [vmem:[#allocation6 + $0x50] sm:$0xff]   ;;  %v2539_v19 = vld [vmem:[#allocation6 + $0x60] sm:$0xff]  }
  0xbc   :  { %1195 = vmatpush1.bf16.msra.mxu0 %v2528_v17  ;;  %1123 = vmatprep.mubr.bf16.mxu0 %v186_v18  ;;  %v2537_v17 = vld [vmem:[#allocation6 + $0x58] sm:$0xff]  }
  0xbd   :  { %2151 = vmatpush3.bf16.msra.mxu1 %v2532_v12  ;;  %v2538_v18 = vld [vmem:[#allocation6 + $0x18] sm:$0xff]  }
  0xbe   :  { %2152 = vmatprep.subr.bf16.mxu1 %v2533_v13 }
  0xc1   :  { %2153 = vmatpush3.bf16.msra.mxu1 %v2534_v14 }
  0xc2   :  { %1164 = vmatmul.mubr.bf16.gmra.mrb[36].mxu1 %v213_v29  ;;  %2154 = vmatprep.subr.bf16.mxu1 %v2535_v15 }
  0xc3   :  { %1124 = vmatmul.mubr.bf16.gmra.mrb[4].mxu0 %v185_v28  ;;  %1173 = vmatprep.mubr.bf16.mxu1 %v221_v31 }
  0xc4   :  { %1133 = vmatprep.mubr.bf16.mxu0 %v193_v30 }
  0xc5   :  { %2155 = vmatpush3.bf16.msra.mxu1 %v2536_v16 }
  0xc6   :  { %2156 = vmatprep.subr.bf16.mxu1 %v2537_v17 }
  0xc9   :  { %2157 = vmatpush3.bf16.msra.mxu1 %v2538_v18 }
  0xca   :  { %1174 = vmatmul.mubr.bf16.gmra.mrb[40].mxu1 %v220_v41  ;;  %2158 = vmatprep.subr.bf16.mxu1 %v2539_v19 }
  0xcb   :  { %1134 = vmatmul.mubr.bf16.gmra.mrb[8].mxu0 %v192_v40  ;;  %1183 = vmatprep.mubr.bf16.mxu1 %v228_v43  ;;  %v331_v40 = vshrl.u32 %v330_v36, 7 }
  0xcc   :  { %1143 = vmatprep.mubr.bf16.mxu0 %v200_v42 }
  0xcd   :  { %2159 = vmatpush3.bf16.msra.mxu1 %v2540_v20  ;;  %v332_v42 = vsub.s32 0, %v331_v40  ;;  %v336_v45 = vsub.s32 1, %v331_v40 }
  0xce   :  { %2160 = vmatprep.subr.bf16.mxu1 %v2541_v21 }
  0xd1   :  { %2161 = vmatpush3.bf16.msra.mxu1 %v2542_v22 }
  0xd2   :  { %1184 = vmatmul.mubr.bf16.gmra.mrb[44].mxu1 %v227_v49  ;;  %2162 = vmatprep.subr.bf16.mxu1 %v2543_v23  ;;  %v2866_v49 = vrot.slane %v328_v44, %v336_v45 }
  0xd3   :  { %1144 = vmatmul.mubr.bf16.gmra.mrb[12].mxu0 %v199_v48  ;;  %v2864_v48 = vrot.slane %v328_v44, %v332_v42 }
  0xd4   :  { %1226 = vmatprep.mubr.bf16.mxu0 %v2754_v50 }
  0xd5   :  { %2163 = vmatpush3.bf16.msra.mxu1 %v2544_v24 }
  0xd6   :  { %2164 = vmatprep.subr.bf16.mxu1 %v2545_v25 }
  0xd9   :  { %2165 = vmatpush3.bf16.msra.mxu1 %v2546_v26 }
  0xdb   :  { %2046 = vmatmul.mubr.msk.bf16.vlgmr.msra.gmra.mrb[0].mxu0 %vm830_vm0, %v180_v53 }
  0xdc   :  { %1236 = vmatprep.mubr.bf16.mxu0 %v2754_v50 }
  0xe3   :  { %2047 = vmatmul.mubr.msk.bf16.gmra.mrb[4].mxu0 %vm830_vm0, %v187_v56 }
  0xe4   :  { %1246 = vmatprep.mubr.bf16.mxu0 %v2754_v50 }
  0xeb   :  { %2048 = vmatmul.mubr.msk.bf16.gmra.mrb[8].mxu0 %vm830_vm0, %v194_v59 }
  0xec   :  { %1256 = vmatprep.mubr.bf16.mxu0 %v2754_v50 }
  0xf3   :  { %2049 = vmatmul.mubr.msk.bf16.gmra.mrb[12].mxu0 %vm830_vm0, %v201_v62 }
  0xf4   :  { %1266 = vmatprep.mubr.bf16.mxu0 %v2754_v50 }
  0xfb   :  { %2050 = vmatmul.mubr.msk.bf16.gmra.mrb[32].mxu0 %vm830_vm0, %v208_v1 }
  0xfc   :  { %1276 = vmatprep.mubr.bf16.mxu0 %v2754_v50 }
 0x103   :  { %2051 = vmatmul.mubr.msk.bf16.gmra.mrb[36].mxu0 %vm830_vm0, %v215_v4 }
 0x104   :  { %1286 = vmatprep.mubr.bf16.mxu0 %v2754_v50 }
 0x10b   :  { %2052 = vmatmul.mubr.msk.bf16.gmra.mrb[40].mxu0 %vm830_vm0, %v222_v7 }
 0x10c   :  { %1296 = vmatprep.mubr.bf16.mxu0 %v2754_v50 }
 0x113   :  { %2053 = vmatmul.mubr.msk.bf16.gmra.mrb[44].mxu0 %vm830_vm0, %v229_v10 }
 0x14d   :  { %v2829_v27 = vpop.f32.mrb[0].mxu1 }
 0x14e   :  { %v2831_v28 = vpop.f32.mrb[1].mxu1 }
 0x14f   :  { %v2833_v29 = vpop.f32.mrb[2].mxu1 }
 0x150   :  { %v2835_v30 = vpop.f32.mrb[3].mxu1 }
 0x155   :  { %v2837_v31 = vpop.f32.mrb[4].mxu1 }
 0x156   :  { %v2839_v32 = vpop.f32.mrb[5].mxu1 }
 0x157   :  { %v2841_v33 = vpop.f32.mrb[6].mxu1 }
 0x158   :  { %v2843_v34 = vpop.f32.mrb[7].mxu1 }
 0x15d   :  { %v2845_v35 = vpop.f32.mrb[8].mxu1 }
 0x15e   :  { %v2847_v37 = vpop.f32.mrb[9].mxu1 }
 0x15f   :  { %v2849_v38 = vpop.f32.mrb[10].mxu1 }
 0x160   :  { %v2851_v39 = vpop.f32.mrb[11].mxu1 }
 0x165   :  { %v2853_v41 = vpop.f32.mrb[12].mxu1 }
 0x166   :  { %v2855_v43 = vpop.f32.mrb[13].mxu1 }
 0x167   :  { %v2860_v46 = vpop.f32.mrb[14].mxu1 }
 0x168   :  { %v2862_v47 = vpop.f32.mrb[15].mxu1 }
 0x16d   :  { %v929_v50 = vpop.f32.mrb[16].mxu1 }
 0x16e   :  { %v1042_v51 = vpop.f32.mrb[16].mxu0  ;;  %v930_v52 = vadd.f32 %v929_v50, %v2864_v48  ;;  %v931_v53 = vpop.f32.mrb[17].mxu1 }
 0x16f   :  { %v1044_v54 = vpop.f32.mrb[17].mxu0  ;;  %v932_v55 = vadd.f32 %v931_v53, %v2866_v49  ;;  %v933_v56 = vpop.f32.mrb[18].mxu1 }
 0x170   :  { %v1046_v57 = vpop.f32.mrb[18].mxu0  ;;  %v1043_v58 = vadd.f32 %v1042_v51, %v930_v52  ;;  %v934_v59 = vadd.f32 %v933_v56, %v2864_v48  ;;  %v935_v60 = vpop.f32.mrb[19].mxu1 }
 0x171   :  { %v1048_v61 = vpop.f32.mrb[19].mxu0  ;;  %v1045_v62 = vadd.f32 %v1044_v54, %v932_v55  ;;  %v936_v63 = vadd.f32 %v935_v60, %v2866_v49 }
 0x172   :  { %v1047_v0 = vadd.f32 %v1046_v57, %v934_v59 }
 0x173   :  { %v1049_v1 = vadd.f32 %v1048_v61, %v936_v63 }
 0x175   :  { %v939_v2 = vpop.f32.mrb[20].mxu1 }
 0x176   :  { %v1052_v3 = vpop.f32.mrb[20].mxu0  ;;  %v940_v4 = vadd.f32 %v939_v2, %v2864_v48  ;;  %v941_v5 = vpop.f32.mrb[21].mxu1 }
 0x177   :  { %v1054_v6 = vpop.f32.mrb[21].mxu0  ;;  %v942_v7 = vadd.f32 %v941_v5, %v2866_v49  ;;  %v943_v8 = vpop.f32.mrb[22].mxu1 }
 0x178   :  { %v1056_v9 = vpop.f32.mrb[22].mxu0  ;;  %v1053_v10 = vadd.f32 %v1052_v3, %v940_v4  ;;  %v944_v11 = vadd.f32 %v943_v8, %v2864_v48  ;;  %v945_v12 = vpop.f32.mrb[23].mxu1 }
 0x179   :  { %v1058_v13 = vpop.f32.mrb[23].mxu0  ;;  %v1055_v14 = vadd.f32 %v1054_v6, %v942_v7  ;;  %v946_v15 = vadd.f32 %v945_v12, %v2866_v49 }
 0x17a   :  { %v1057_v16 = vadd.f32 %v1056_v9, %v944_v11 }
 0x17b   :  { %v1059_v17 = vadd.f32 %v1058_v13, %v946_v15 }
 0x17d   :  { %v949_v18 = vpop.f32.mrb[24].mxu1 }
 0x17e   :  { %v1062_v19 = vpop.f32.mrb[24].mxu0  ;;  %v950_v20 = vadd.f32 %v949_v18, %v2864_v48  ;;  %v951_v21 = vpop.f32.mrb[25].mxu1 }
 0x17f   :  { %v1064_v22 = vpop.f32.mrb[25].mxu0  ;;  %v952_v23 = vadd.f32 %v951_v21, %v2866_v49  ;;  %v953_v24 = vpop.f32.mrb[26].mxu1 }
 0x180   :  { %v1066_v25 = vpop.f32.mrb[26].mxu0  ;;  %v1063_v26 = vadd.f32 %v1062_v19, %v950_v20  ;;  %v954_v36 = vadd.f32 %v953_v24, %v2864_v48  ;;  %v955_v40 = vpop.f32.mrb[27].mxu1 }
 0x181   :  { %v1068_v42 = vpop.f32.mrb[27].mxu0  ;;  %v1065_v44 = vadd.f32 %v1064_v22, %v952_v23  ;;  %v956_v45 = vadd.f32 %v955_v40, %v2866_v49 }
 0x182   :  { %v1067_v50 = vadd.f32 %v1066_v25, %v954_v36 }
 0x183   :  { %v1069_v51 = vadd.f32 %v1068_v42, %v956_v45 }
 0x185   :  { %v959_v52 = vpop.f32.mrb[28].mxu1 }
 0x186   :  { %v1072_v53 = vpop.f32.mrb[28].mxu0  ;;  %v960_v54 = vadd.f32 %v959_v52, %v2864_v48  ;;  %v961_v55 = vpop.f32.mrb[29].mxu1 }
 0x187   :  { %v1074_v56 = vpop.f32.mrb[29].mxu0  ;;  %v962_v57 = vadd.f32 %v961_v55, %v2866_v49  ;;  %v963_v59 = vpop.f32.mrb[30].mxu1 }
 0x188   :  { %v1076_v60 = vpop.f32.mrb[30].mxu0  ;;  %v1073_v61 = vadd.f32 %v1072_v53, %v960_v54  ;;  %v964_v63 = vadd.f32 %v963_v59, %v2864_v48  ;;  %v965_v2 = vpop.f32.mrb[31].mxu1 }
 0x189   :  { %v1078_v3 = vpop.f32.mrb[31].mxu0  ;;  %v1075_v4 = vadd.f32 %v1074_v56, %v962_v57  ;;  %v966_v5 = vadd.f32 %v965_v2, %v2866_v49  ;;  %v894_v57 = vadd.f32 %v2833_v29, %v2864_v48  ;;  %v902_v29 = vadd.f32 %v2839_v32, %v2866_v49 }
 0x18a   :  { %v1077_v6 = vadd.f32 %v1076_v60, %v964_v63 }
 0x18b   :  { %v1079_v7 = vadd.f32 %v1078_v3, %v966_v5 }
 0x18d   :  { %v1155_v8 = vpop.f32.mrb[32].mxu1 }
 0x18e   :  { %v2884_v9 = vadd.f32 %v1155_v8, %v1043_v58  ;;  %v1157_v11 = vpop.f32.mrb[33].mxu1  ;;  %v900_v8 = vadd.f32 %v2837_v31, %v2864_v48 }
 0x18f   :  { %v2886_v12 = vadd.f32 %v1157_v11, %v1045_v62  ;;  %v1159_v13 = vpop.f32.mrb[34].mxu1  ;;  %v904_v11 = vadd.f32 %v2841_v33, %v2864_v48  ;;  %v910_v33 = vadd.f32 %v2845_v35, %v2864_v48 }
 0x190   :  { %v2888_v15 = vadd.f32 %v1159_v13, %v1047_v0  ;;  %v1161_v18 = vpop.f32.mrb[35].mxu1 }
 0x191   :  { %v2890_v19 = vadd.f32 %v1161_v18, %v1049_v1 }
 0x195   :  { %v1165_v20 = vpop.f32.mrb[36].mxu1 }
 0x196   :  { %v2892_v21 = vadd.f32 %v1165_v20, %v1053_v10  ;;  %v1167_v22 = vpop.f32.mrb[37].mxu1  ;;  %v906_v20 = vadd.f32 %v2843_v34, %v2866_v49  ;;  %v912_v34 = vadd.f32 %v2847_v37, %v2866_v49 }
 0x197   :  { %v2894_v23 = vadd.f32 %v1167_v22, %v1055_v14  ;;  %v1169_v24 = vpop.f32.mrb[38].mxu1 }
 0x198   :  { %v2896_v25 = vadd.f32 %v1169_v24, %v1057_v16  ;;  %v1171_v58 = vpop.f32.mrb[39].mxu1 }
 0x199   :  { %v2898_v36 = vadd.f32 %v1171_v58, %v1059_v17 }
 0x19d   :  { %v1175_v62 = vpop.f32.mrb[40].mxu1 }
 0x19e   :  { %v2900_v40 = vadd.f32 %v1175_v62, %v1063_v26  ;;  %v1177_v0 = vpop.f32.mrb[41].mxu1 }
 0x19f   :  { %v2902_v42 = vadd.f32 %v1177_v0, %v1065_v44  ;;  %v1179_v1 = vpop.f32.mrb[42].mxu1  ;;  %v890_v44 = vadd.f32 %v2829_v27, %v2864_v48 }
 0x1a0   :  { %v2904_v45 = vadd.f32 %v1179_v1, %v1067_v50  ;;  %v1181_v10 = vpop.f32.mrb[43].mxu1  ;;  %v892_v50 = vadd.f32 %v2831_v28, %v2866_v49 }
 0x1a1   :  { %v2906_v52 = vadd.f32 %v1181_v10, %v1069_v51 }
 0x1a5   :  { %v1185_v14 = vpop.f32.mrb[44].mxu1 }
 0x1a6   :  { %v2908_v53 = vadd.f32 %v1185_v14, %v1073_v61  ;;  %v1187_v16 = vpop.f32.mrb[45].mxu1  ;;  %v896_v61 = vadd.f32 %v2835_v30, %v2866_v49 }
 0x1a7   :  { %v2910_v54 = vadd.f32 %v1187_v16, %v1075_v4  ;;  %v1189_v17 = vpop.f32.mrb[46].mxu1 }
 0x1a8   :  { %v2912_v55 = vadd.f32 %v1189_v17, %v1077_v6  ;;  %v1191_v26 = vpop.f32.mrb[47].mxu1 }
 0x1a9   :  { %v2914_v56 = vadd.f32 %v1191_v26, %v1079_v7 }
 0x1ae   :  { %v1228_v51 = vpop.f32.mrb[0].mxu0 }
 0x1af   :  { %v2247_v59 = vadd.f32 %v1228_v51, %v890_v44  ;;  %v1230_v60 = vpop.f32.mrb[1].mxu0 }
 0x1b0   :  { %v2249_v63 = vadd.f32 %v1230_v60, %v892_v50  ;;  %v1232_v2 = vpop.f32.mrb[2].mxu0  ;;  %v914_v50 = vadd.f32 %v2849_v38, %v2864_v48 }
 0x1b1   :  { %v1307_v3 = vmul.f32 0.5, %v2247_v59  ;;  %v2251_v4 = vadd.f32 %v1232_v2, %v894_v57  ;;  %v1234_v5 = vpop.f32.mrb[3].mxu0 }
 0x1b2   :  { %v1308_v6 = vmul.f32 0.5, %v2249_v63  ;;  %v2253_v7 = vadd.f32 %v1234_v5, %v896_v61  ;;  %v916_v61 = vadd.f32 %v2851_v39, %v2866_v49  ;;  %v920_v39 = vadd.f32 %v2853_v41, %v2864_v48 }
 0x1b3   :  { %2547 = vtanh.f32 %v1307_v3  ;;  %v1309_v27 = vmul.f32 0.5, %v2251_v4  ;;  %v926_v41 = vadd.f32 %v2862_v47, %v2866_v49 }
 0x1b4   :  { %2549 = vtanh.f32 %v1308_v6  ;;  %v1310_v28 = vmul.f32 0.5, %v2253_v7 }
 0x1b5   :  { %2551 = vtanh.f32 %v1309_v27 }
 0x1b6   :  { %2553 = vtanh.f32 %v1310_v28  ;;  %v1238_v30 = vpop.f32.mrb[4].mxu0 }
 0x1b7   :  { %v2255_v13 = vadd.f32 %v1238_v30, %v900_v8  ;;  %v1240_v18 = vpop.f32.mrb[5].mxu0 }
 0x1b8   :  { %v2257_v22 = vadd.f32 %v1240_v18, %v902_v29  ;;  %v1242_v24 = vpop.f32.mrb[6].mxu0 }
 0x1b9   :  { %v1311_v58 = vmul.f32 0.5, %v2255_v13  ;;  %v2259_v62 = vadd.f32 %v1242_v24, %v904_v11  ;;  %v1244_v0 = vpop.f32.mrb[7].mxu0 }
 0x1ba   :  { %v1312_v31 = vmul.f32 0.5, %v2257_v22  ;;  %v2261_v1 = vadd.f32 %v1244_v0, %v906_v20  ;;  %v922_v22 = vadd.f32 %v2855_v43, %v2866_v49  ;;  %v924_v0 = vadd.f32 %v2860_v46, %v2864_v48 }
 0x1bb   :  { %2555 = vtanh.f32 %v1311_v58  ;;  %v1313_v10 = vmul.f32 0.5, %v2259_v62 }
 0x1bc   :  { %2557 = vtanh.f32 %v1312_v31  ;;  %v1314_v32 = vmul.f32 0.5, %v2261_v1 }
 0x1bd   :  { %v2548_v14 = vpop.eup %2547  ;;  %2559 = vtanh.f32 %v1313_v10 }
 0x1be   :  { %v2550_v16 = vpop.eup %2549  ;;  %v1371_v17 = vadd.f32 1.0, %v2548_v14  ;;  %2561 = vtanh.f32 %v1314_v32  ;;  %v1248_v26 = vpop.f32.mrb[8].mxu0 }
 0x1bf   :  { %v2552_v44 = vpop.eup %2551  ;;  %v1372_v51 = vadd.f32 1.0, %v2550_v16  ;;  %v2263_v57 = vadd.f32 %v1248_v26, %v910_v33  ;;  %v1250_v59 = vpop.f32.mrb[9].mxu0 }
 0x1c0   :  { %v2554_v60 = vpop.eup %2553  ;;  %v1373_v35 = vadd.f32 1.0, %v2552_v44  ;;  %v2265_v63 = vadd.f32 %v1250_v59, %v912_v34  ;;  %v1252_v2 = vpop.f32.mrb[10].mxu0  ;;  %v1403_v6 = vmul.f32 0.5, %v1371_v17 }
 0x1c1   :  { %v1374_v3 = vadd.f32 1.0, %v2554_v60  ;;  %v1315_v4 = vmul.f32 0.5, %v2263_v57  ;;  %v2267_v37 = vadd.f32 %v1252_v2, %v914_v50  ;;  %v1254_v5 = vpop.f32.mrb[11].mxu0  ;;  %v1404_v8 = vmul.f32 0.5, %v1372_v51 }
 0x1c2   :  { %v1405_v7 = vmul.f32 0.5, %v1373_v35  ;;  %v1316_v27 = vmul.f32 0.5, %v2265_v63  ;;  %v2269_v28 = vadd.f32 %v1254_v5, %v916_v61 }
 0x1c3   :  { %v1406_v38 = vmul.f32 0.5, %v1374_v3  ;;  %2563 = vtanh.f32 %v1315_v4  ;;  %v1317_v29 = vmul.f32 0.5, %v2267_v37 }
 0x1c4   :  { %v1435_v30 = vpack.c.bf16 %v1405_v7, %v1403_v6  ;;  %2565 = vtanh.f32 %v1316_v27  ;;  %v1318_v11 = vmul.f32 0.5, %v2269_v28 }
 0x1c5   :  { %v2556_v13 = vpop.eup %2555  ;;  %2567 = vtanh.f32 %v1317_v29  ;;  %v1436_v18 = vpack.c.bf16 %v1406_v38, %v1404_v8 }
 0x1c6   :  { %v2558_v20 = vpop.eup %2557  ;;  %v1375_v24 = vadd.f32 1.0, %v2556_v13  ;;  %2569 = vtanh.f32 %v1318_v11  ;;  %v1258_v58 = vpop.f32.mrb[12].mxu0 }
 0x1c7   :  { %v2560_v62 = vpop.eup %2559  ;;  %v1376_v31 = vadd.f32 1.0, %v2558_v20  ;;  %v2271_v1 = vadd.f32 %v1258_v58, %v920_v39  ;;  %v1260_v10 = vpop.f32.mrb[13].mxu0  ;;  %1618 = vmatprep.mubr.bf16.mxu1 %v1436_v18 }
 0x1c8   :  { %v2562_v32 = vpop.eup %2561  ;;  %v1377_v14 = vadd.f32 1.0, %v2560_v62  ;;  %v2273_v33 = vadd.f32 %v1260_v10, %v922_v22  ;;  %v1262_v16 = vpop.f32.mrb[14].mxu0  ;;  %1619 = vmatmul.mubr.bf16.vlgmr.msra.gmra.mrb[48].mxu1 %v1435_v30  ;;  %v1407_v44 = vmul.f32 0.5, %v1375_v24 }
 0x1c9   :  { %v1378_v43 = vadd.f32 1.0, %v2562_v32  ;;  %v1319_v34 = vmul.f32 0.5, %v2271_v1  ;;  %v2275_v17 = vadd.f32 %v1262_v16, %v924_v0  ;;  %v1264_v26 = vpop.f32.mrb[15].mxu0  ;;  %v1408_v48 = vmul.f32 0.5, %v1376_v31 }
 0x1ca   :  { %v1409_v50 = vmul.f32 0.5, %v1377_v14  ;;  %v1320_v51 = vmul.f32 0.5, %v2273_v33  ;;  %v2277_v46 = vadd.f32 %v1264_v26, %v926_v41 }
 0x1cb   :  { %v1410_v57 = vmul.f32 0.5, %v1378_v43  ;;  %2571 = vtanh.f32 %v1319_v34  ;;  %v1321_v59 = vmul.f32 0.5, %v2275_v17 }
 0x1cc   :  { %2573 = vtanh.f32 %v1320_v51  ;;  %v1322_v60 = vmul.f32 0.5, %v2277_v46  ;;  %v1437_v61 = vpack.c.bf16 %v1409_v50, %v1407_v44 }
 0x1cd   :  { %v2564_v47 = vpop.eup %2563  ;;  %2575 = vtanh.f32 %v1321_v59  ;;  %v1438_v49 = vpack.c.bf16 %v1410_v57, %v1408_v48 }
 0x1ce   :  { %v2566_v35 = vpop.eup %2565  ;;  %v1379_v63 = vadd.f32 1.0, %v2564_v47  ;;  %2577 = vtanh.f32 %v1322_v60  ;;  %v1268_v2 = vpop.f32.mrb[32].mxu0 }
 0x1cf   :  { %v2568_v3 = vpop.eup %2567  ;;  %v1380_v4 = vadd.f32 1.0, %v2566_v35  ;;  %v1269_v37 = vadd.f32 %v1268_v2, %v2884_v9  ;;  %v1270_v5 = vpop.f32.mrb[33].mxu0  ;;  %1626 = vmatprep.mubr.bf16.mxu1 %v1438_v49 }
 0x1d0   :  { %v2570_v6 = vpop.eup %2569  ;;  %v1381_v7 = vadd.f32 1.0, %v2568_v3  ;;  %v1271_v27 = vadd.f32 %v1270_v5, %v2886_v12  ;;  %v1272_v28 = vpop.f32.mrb[34].mxu0  ;;  %1627 = vmatmul.mubr.bf16.gmra.mrb[52].mxu1 %v1437_v61  ;;  %v1411_v11 = vmul.f32 0.5, %v1379_v63 }
 0x1d1   :  { %v1382_v8 = vadd.f32 1.0, %v2570_v6  ;;  %v1323_v38 = vmul.f32 0.5, %v1269_v37  ;;  %v1273_v29 = vadd.f32 %v1272_v28, %v2888_v15  ;;  %v1274_v30 = vpop.f32.mrb[35].mxu0  ;;  %v1412_v20 = vmul.f32 0.5, %v1380_v4 }
 0x1d2   :  { %v1413_v13 = vmul.f32 0.5, %v1381_v7  ;;  %v1324_v39 = vmul.f32 0.5, %v1271_v27  ;;  %v1275_v18 = vadd.f32 %v1274_v30, %v2890_v19 }
 0x1d3   :  { %v1414_v9 = vmul.f32 0.5, %v1382_v8  ;;  %2579 = vtanh.f32 %v1323_v38  ;;  %v1325_v22 = vmul.f32 0.5, %v1273_v29 }
 0x1d4   :  { %2581 = vtanh.f32 %v1324_v39  ;;  %v1326_v24 = vmul.f32 0.5, %v1275_v18  ;;  %v1439_v58 = vpack.c.bf16 %v1413_v13, %v1411_v11 }
 0x1d5   :  { %v2572_v12 = vpop.eup %2571  ;;  %2583 = vtanh.f32 %v1325_v22  ;;  %v1440_v62 = vpack.c.bf16 %v1414_v9, %v1412_v20 }
 0x1d6   :  { %v2574_v0 = vpop.eup %2573  ;;  %v1383_v31 = vadd.f32 1.0, %v2572_v12  ;;  %2585 = vtanh.f32 %v1326_v24  ;;  %v1278_v15 = vpop.f32.mrb[36].mxu0 }
 0x1d7   :  { %v2576_v1 = vpop.eup %2575  ;;  %v1384_v10 = vadd.f32 1.0, %v2574_v0  ;;  %v1279_v32 = vadd.f32 %v1278_v15, %v2892_v21  ;;  %v1280_v41 = vpop.f32.mrb[37].mxu0  ;;  %1634 = vmatprep.mubr.bf16.mxu1 %v1440_v62 }
 0x1d8   :  { %v2578_v19 = vpop.eup %2577  ;;  %v1385_v14 = vadd.f32 1.0, %v2576_v1  ;;  %v1281_v33 = vadd.f32 %v1280_v41, %v2894_v23  ;;  %v1282_v16 = vpop.f32.mrb[38].mxu0  ;;  %1635 = vmatmul.mubr.bf16.gmra.mrb[56].mxu1 %v1439_v58  ;;  %v1415_v44 = vmul.f32 0.5, %v1383_v31 }
 0x1d9   :  { %v1386_v43 = vadd.f32 1.0, %v2578_v19  ;;  %v1327_v34 = vmul.f32 0.5, %v1279_v32  ;;  %v1283_v17 = vadd.f32 %v1282_v16, %v2896_v25  ;;  %v1284_v26 = vpop.f32.mrb[39].mxu0  ;;  %v1416_v48 = vmul.f32 0.5, %v1384_v10 }
 0x1da   :  { %v1417_v50 = vmul.f32 0.5, %v1385_v14  ;;  %v1328_v51 = vmul.f32 0.5, %v1281_v33  ;;  %v1285_v46 = vadd.f32 %v1284_v26, %v2898_v36 }
 0x1db   :  { %v1418_v21 = vmul.f32 0.5, %v1386_v43  ;;  %2587 = vtanh.f32 %v1327_v34  ;;  %v1329_v57 = vmul.f32 0.5, %v1283_v17 }
 0x1dc   :  { %2589 = vtanh.f32 %v1328_v51  ;;  %v1330_v59 = vmul.f32 0.5, %v1285_v46  ;;  %v1441_v60 = vpack.c.bf16 %v1417_v50, %v1415_v44 }
 0x1dd   :  { %v2580_v23 = vpop.eup %2579  ;;  %2591 = vtanh.f32 %v1329_v57  ;;  %v1442_v61 = vpack.c.bf16 %v1418_v21, %v1416_v48 }
 0x1de   :  { %v2582_v47 = vpop.eup %2581  ;;  %v1387_v49 = vadd.f32 1.0, %v2580_v23  ;;  %2593 = vtanh.f32 %v1330_v59  ;;  %v1288_v25 = vpop.f32.mrb[40].mxu0 }
 0x1df   :  { %v2584_v35 = vpop.eup %2583  ;;  %v1388_v63 = vadd.f32 1.0, %v2582_v47  ;;  %v1289_v2 = vadd.f32 %v1288_v25, %v2900_v40  ;;  %v1290_v3 = vpop.f32.mrb[41].mxu0  ;;  %1642 = vmatprep.mubr.bf16.mxu1 %v1442_v61 }
 0x1e0   :  { %v2586_v36 = vpop.eup %2585  ;;  %v1389_v4 = vadd.f32 1.0, %v2584_v35  ;;  %v1291_v37 = vadd.f32 %v1290_v3, %v2902_v42  ;;  %v1292_v5 = vpop.f32.mrb[42].mxu0  ;;  %1643 = vmatmul.mubr.bf16.gmra.mrb[60].mxu1 %v1441_v60  ;;  %v1419_v8 = vmul.f32 0.5, %v1387_v49 }
 0x1e1   :  { %v1390_v6 = vadd.f32 1.0, %v2586_v36  ;;  %v1331_v7 = vmul.f32 0.5, %v1289_v2  ;;  %v1293_v27 = vadd.f32 %v1292_v5, %v2904_v45  ;;  %v1294_v28 = vpop.f32.mrb[43].mxu0  ;;  %v1420_v11 = vmul.f32 0.5, %v1388_v63 }
 0x1e2   :  { %v1421_v38 = vmul.f32 0.5, %v1389_v4  ;;  %v1332_v29 = vmul.f32 0.5, %v1291_v37  ;;  %v1295_v30 = vadd.f32 %v1294_v28, %v2906_v52 }
 0x1e3   :  { %v1422_v40 = vmul.f32 0.5, %v1390_v6  ;;  %2595 = vtanh.f32 %v1331_v7  ;;  %v1333_v13 = vmul.f32 0.5, %v1293_v27 }
 0x1e4   :  { %2597 = vtanh.f32 %v1332_v29  ;;  %v1334_v39 = vmul.f32 0.5, %v1295_v30  ;;  %v1443_v18 = vpack.c.bf16 %v1421_v38, %v1419_v8  ;;  %v2967_v29 = vld [vmem:[%s3064_s4] ss:$0 sm:$0xff] }
 0x1e5   :  { %v2588_v42 = vpop.eup %2587  ;;  %2599 = vtanh.f32 %v1333_v13  ;;  %v1444_v20 = vpack.c.bf16 %v1422_v40, %v1420_v11 }
 0x1e6   :  { %v2590_v9 = vpop.eup %2589  ;;  %v1391_v22 = vadd.f32 1.0, %v2588_v42  ;;  %2601 = vtanh.f32 %v1334_v39  ;;  %v1298_v45 = vpop.f32.mrb[44].mxu0 }
 0x1e7   :  { %v2592_v24 = vpop.eup %2591  ;;  %v1392_v58 = vadd.f32 1.0, %v2590_v9  ;;  %v1299_v12 = vadd.f32 %v1298_v45, %v2908_v53  ;;  %v1300_v62 = vpop.f32.mrb[45].mxu0  ;;  %1650 = vmatprep.mubr.bf16.mxu1 %v1444_v20 }
 0x1e8   :  { %v2594_v52 = vpop.eup %2593  ;;  %v1393_v0 = vadd.f32 1.0, %v2592_v24  ;;  %v1301_v31 = vadd.f32 %v1300_v62, %v2910_v54  ;;  %v1302_v15 = vpop.f32.mrb[46].mxu0  ;;  %1651 = vmatmul.mubr.bf16.gmra.mrb[64].mxu1 %v1443_v18  ;;  %v1423_v19 = vmul.f32 0.5, %v1391_v22 }
 0x1e9   :  { %v1394_v1 = vadd.f32 1.0, %v2594_v52  ;;  %v1335_v10 = vmul.f32 0.5, %v1299_v12  ;;  %v1303_v32 = vadd.f32 %v1302_v15, %v2912_v55  ;;  %v1304_v41 = vpop.f32.mrb[47].mxu0  ;;  %v1424_v43 = vmul.f32 0.5, %v1392_v58 }
 0x1ea   :  { %v1425_v14 = vmul.f32 0.5, %v1393_v0  ;;  %v1336_v33 = vmul.f32 0.5, %v1301_v31  ;;  %v1305_v16 = vadd.f32 %v1304_v41, %v2914_v56 }
 0x1eb   :  { %v1426_v53 = vmul.f32 0.5, %v1394_v1  ;;  %2603 = vtanh.f32 %v1335_v10  ;;  %v1337_v34 = vmul.f32 0.5, %v1303_v32 }
 0x1ec   :  { %2605 = vtanh.f32 %v1336_v33  ;;  %v1338_v17 = vmul.f32 0.5, %v1305_v16  ;;  %v1445_v26 = vpack.c.bf16 %v1425_v14, %v1423_v19 }
 0x1ed   :  { %v2596_v54 = vpop.eup %2595  ;;  %2607 = vtanh.f32 %v1337_v34  ;;  %v1446_v44 = vpack.c.bf16 %v1426_v53, %v1424_v43 }
 0x1ee   :  { %v2598_v50 = vpop.eup %2597  ;;  %v1395_v51 = vadd.f32 1.0, %v2596_v54  ;;  %2609 = vtanh.f32 %v1338_v17 }
 0x1ef   :  { %v2600_v55 = vpop.eup %2599  ;;  %v1396_v46 = vadd.f32 1.0, %v2598_v50  ;;  %1658 = vmatprep.mubr.bf16.mxu1 %v1446_v44 }
 0x1f0   :  { %v2602_v48 = vpop.eup %2601  ;;  %v1397_v21 = vadd.f32 1.0, %v2600_v55  ;;  %1659 = vmatmul.mubr.bf16.gmra.mrb[68].mxu1 %v1445_v26  ;;  %v1427_v57 = vmul.f32 0.5, %v1395_v51 }
 0x1f1   :  { %v1398_v56 = vadd.f32 1.0, %v2602_v48  ;;  %v1428_v60 = vmul.f32 0.5, %v1396_v46 }
 0x1f2   :  { %v1429_v59 = vmul.f32 0.5, %v1397_v21 }
 0x1f3   :  { %v1430_v23 = vmul.f32 0.5, %v1398_v56 }
 0x1f4   :  { %v1447_v61 = vpack.c.bf16 %v1429_v59, %v1427_v57 }
 0x1f5   :  { %v2604_v47 = vpop.eup %2603  ;;  %v1448_v49 = vpack.c.bf16 %v1430_v23, %v1428_v60 }
 0x1f6   :  { %v2606_v25 = vpop.eup %2605  ;;  %v1399_v35 = vadd.f32 1.0, %v2604_v47 }
 0x1f7   :  { %v2608_v63 = vpop.eup %2607  ;;  %v1400_v2 = vadd.f32 1.0, %v2606_v25  ;;  %1666 = vmatprep.mubr.bf16.mxu1 %v1448_v49 }
 0x1f8   :  { %v2610_v3 = vpop.eup %2609  ;;  %v1401_v36 = vadd.f32 1.0, %v2608_v63  ;;  %1667 = vmatmul.mubr.bf16.gmra.mrb[72].mxu1 %v1447_v61  ;;  %v1431_v37 = vmul.f32 0.5, %v1399_v35 }
 0x1f9   :  { %v1402_v4 = vadd.f32 1.0, %v2610_v3  ;;  %v1432_v6 = vmul.f32 0.5, %v1400_v2 }
 0x1fa   :  { %v1433_v5 = vmul.f32 0.5, %v1401_v36 }
 0x1fb   :  { %v1434_v7 = vmul.f32 0.5, %v1402_v4 }
 0x1fc   :  { %v1449_v27 = vpack.c.bf16 %v1433_v5, %v1431_v37 }
 0x1fd   :  { %v1450_v28 = vpack.c.bf16 %v1434_v7, %v1432_v6 }
 0x1ff   :  { %1674 = vmatprep.mubr.bf16.mxu1 %v1450_v28 }
 0x200   :  { %1675 = vmatmul.mubr.bf16.gmra.mrb[76].mxu1 %v1449_v27 }
 0x29b   :  { %v2166_v8 = vpop.f32.mrb[48].mxu1 }
 0x29c   :  { %v2167_v38 = vpop.f32.mrb[49].mxu1 }
 0x29d   :  { %v2168_v30 = vadd.f32 %v2167_v38, %v2166_v8  ;;  %v2169_v11 = vpop.f32.mrb[50].mxu1 }
 0x29e   :  { %v2170_v40 = vpop.f32.mrb[51].mxu1 }
 0x29f   :  { %v2171_v13 = vadd.f32 %v2170_v40, %v2169_v11  ;;  %v2970_v39 = vadd.f32 %v2168_v30, %v2967_v29 }
 0x2a1   :  { %1683 = vmax.xlane.f32.xlu0 %v2970_v39  ;;  %v2974_v42 = vadd.f32 %v2171_v13, %v2967_v29 }
 0x2a3   :  { %v2172_v18 = vpop.f32.mrb[52].mxu1 }
 0x2a4   :  { %v2173_v20 = vpop.f32.mrb[53].mxu1 }
 0x2a5   :  { %v2174_v9 = vadd.f32 %v2173_v20, %v2172_v18  ;;  %v2175_v22 = vpop.f32.mrb[54].mxu1  ;;  %1685 = vmax.xlane.f32.xlu0 %v2974_v42 }
 0x2a6   :  { %v2176_v45 = vpop.f32.mrb[55].mxu1 }
 0x2a7   :  { %v2177_v24 = vadd.f32 %v2176_v45, %v2175_v22  ;;  %v2978_v58 = vadd.f32 %v2174_v9, %v2967_v29 }
 0x2a9   :  { %1687 = vmax.xlane.f32.xlu1 %v2978_v58  ;;  %v2982_v62 = vadd.f32 %v2177_v24, %v2967_v29 }
 0x2ab   :  { %v2178_v12 = vpop.f32.mrb[56].mxu1 }
 0x2ac   :  { %v2179_v52 = vpop.f32.mrb[57].mxu1 }
 0x2ad   :  { %v2180_v0 = vadd.f32 %v2179_v52, %v2178_v12  ;;  %v2181_v31 = vpop.f32.mrb[58].mxu1  ;;  %1689 = vmax.xlane.f32.xlu1 %v2982_v62 }
 0x2ae   :  { %v2182_v15 = vpop.f32.mrb[59].mxu1 }
 0x2af   :  { %v2183_v1 = vadd.f32 %v2182_v15, %v2181_v31  ;;  %v2986_v10 = vadd.f32 %v2180_v0, %v2967_v29 }
 0x2b1   :  { %1691 = vmax.xlane.f32.xlu0 %v2986_v10  ;;  %v2990_v32 = vadd.f32 %v2183_v1, %v2967_v29 }
 0x2b3   :  { %v2184_v41 = vpop.f32.mrb[60].mxu1  ;;  %1693 = vmax.xlane.f32.xlu1 %v2990_v32 }
 0x2b4   :  { %v2185_v19 = vpop.f32.mrb[61].mxu1 }
 0x2b5   :  { %v2186_v14 = vadd.f32 %v2185_v19, %v2184_v41  ;;  %v2187_v33 = vpop.f32.mrb[62].mxu1 }
 0x2b6   :  { %v2188_v16 = vpop.f32.mrb[63].mxu1 }
 0x2b7   :  { %v2189_v43 = vadd.f32 %v2188_v16, %v2187_v33  ;;  %v2994_v53 = vadd.f32 %v2186_v14, %v2967_v29 }
 0x2b9   :  { %1695 = vmax.xlane.f32.xlu0 %v2994_v53  ;;  %v2998_v34 = vadd.f32 %v2189_v43, %v2967_v29 }
 0x2bb   :  { %v2190_v17 = vpop.f32.mrb[64].mxu1  ;;  %1697 = vmax.xlane.f32.xlu1 %v2998_v34 }
 0x2bc   :  { %v2191_v26 = vpop.f32.mrb[65].mxu1 }
 0x2bd   :  { %v2192_v54 = vadd.f32 %v2191_v26, %v2190_v17  ;;  %v2193_v44 = vpop.f32.mrb[66].mxu1 }
 0x2be   :  { %v2194_v50 = vpop.f32.mrb[67].mxu1 }
 0x2bf   :  { %v2195_v51 = vadd.f32 %v2194_v50, %v2193_v44  ;;  %v3002_v55 = vadd.f32 %v2192_v54, %v2967_v29 }
 0x2c1   :  { %1699 = vmax.xlane.f32.xlu0 %v3002_v55  ;;  %v3006_v46 = vadd.f32 %v2195_v51, %v2967_v29 }
 0x2c3   :  { %v2196_v48 = vpop.f32.mrb[68].mxu1  ;;  %1701 = vmax.xlane.f32.xlu1 %v3006_v46 }
 0x2c4   :  { %v2197_v21 = vpop.f32.mrb[69].mxu1 }
 0x2c5   :  { %v2198_v56 = vadd.f32 %v2197_v21, %v2196_v48  ;;  %v2199_v57 = vpop.f32.mrb[70].mxu1 }
 0x2c6   :  { %v2200_v59 = vpop.f32.mrb[71].mxu1 }
 0x2c7   :  { %v2201_v60 = vadd.f32 %v2200_v59, %v2199_v57  ;;  %v3010_v23 = vadd.f32 %v2198_v56, %v2967_v29 }
 0x2c9   :  { %1703 = vmax.xlane.f32.xlu0 %v3010_v23  ;;  %v3014_v61 = vadd.f32 %v2201_v60, %v2967_v29 }
 0x2cb   :  { %v2202_v47 = vpop.f32.mrb[72].mxu1  ;;  %1705 = vmax.xlane.f32.xlu1 %v3014_v61 }
 0x2cc   :  { %v2203_v49 = vpop.f32.mrb[73].mxu1 }
 0x2cd   :  { %v2204_v25 = vadd.f32 %v2203_v49, %v2202_v47  ;;  %v2205_v35 = vpop.f32.mrb[74].mxu1 }
 0x2ce   :  { %v2206_v63 = vpop.f32.mrb[75].mxu1 }
 0x2cf   :  { %v2207_v2 = vadd.f32 %v2206_v63, %v2205_v35  ;;  %v3018_v3 = vadd.f32 %v2204_v25, %v2967_v29 }
 0x2d1   :  { %1707 = vmax.xlane.f32.xlu0 %v3018_v3  ;;  %v3022_v36 = vadd.f32 %v2207_v2, %v2967_v29 }
 0x2d3   :  { %v2208_v4 = vpop.f32.mrb[76].mxu1  ;;  %1709 = vmax.xlane.f32.xlu1 %v3022_v36 }
 0x2d4   :  { %v2209_v37 = vpop.f32.mrb[77].mxu1 }
 0x2d5   :  { %v2210_v5 = vadd.f32 %v2209_v37, %v2208_v4  ;;  %v2211_v6 = vpop.f32.mrb[78].mxu1 }
 0x2d6   :  { %v2212_v7 = vpop.f32.mrb[79].mxu1 }
 0x2d7   :  { %v2213_v27 = vadd.f32 %v2212_v7, %v2211_v6  ;;  %v3026_v28 = vadd.f32 %v2210_v5, %v2967_v29 }
 0x2d9   :  { %1711 = vmax.xlane.f32.xlu0 %v3026_v28  ;;  %v3030_v8 = vadd.f32 %v2213_v27, %v2967_v29 }
 0x2db   :  { %1713 = vmax.xlane.f32.xlu1 %v3030_v8 }
 0x32e   :  { %v1684_v38 = vpop.xlane.xlu0 %1683 }
 0x32f   :  { %v1715_v30 = vsub.f32 %v2970_v39, %v1684_v38 }
 0x331   :  { %v1731_v11 = vmul.f32 1.442695, %v1715_v30 }
 0x332   :  { %v1686_v40 = vpop.xlane.xlu0 %1685 }
 0x333   :  { %2611 = vpow2.f32 %v1731_v11  ;;  %v1716_v13 = vsub.f32 %v2974_v42, %v1686_v40 }
 0x335   :  { %v1733_v18 = vmul.f32 1.442695, %v1716_v13 }
 0x336   :  { %v1688_v20 = vpop.xlane.xlu1 %1687 }
 0x337   :  { %2613 = vpow2.f32 %v1733_v18  ;;  %v1717_v9 = vsub.f32 %v2978_v58, %v1688_v20 }
 0x339   :  { %v1735_v22 = vmul.f32 1.442695, %v1717_v9 }
 0x33a   :  { %v1690_v45 = vpop.xlane.xlu1 %1689 }
 0x33b   :  { %2615 = vpow2.f32 %v1735_v22  ;;  %v1718_v29 = vsub.f32 %v2982_v62, %v1690_v45 }
 0x33d   :  { %v3037_v24 = vpop.eup %2611  ;;  %v1737_v12 = vmul.f32 1.442695, %v1718_v29 }
 0x33e   :  { %1763 = vadd.xlane.f32.xlu0 %v3037_v24  ;;  %v1692_v39 = vpop.xlane.xlu0 %1691 }
 0x33f   :  { %2617 = vpow2.f32 %v1737_v12  ;;  %v1719_v52 = vsub.f32 %v2986_v10, %v1692_v39 }
 0x340   :  { %v1694_v42 = vpop.xlane.xlu1 %1693 }
 0x341   :  { %v3041_v0 = vpop.eup %2613  ;;  %v1739_v31 = vmul.f32 1.442695, %v1719_v52  ;;  %v1720_v58 = vsub.f32 %v2990_v32, %v1694_v42 }
 0x342   :  { %1765 = vadd.xlane.f32.xlu1 %v3041_v0 }
 0x343   :  { %2619 = vpow2.f32 %v1739_v31  ;;  %v1741_v15 = vmul.f32 1.442695, %v1720_v58 }
 0x345   :  { %v2616_v62 = vpop.eup %2615  ;;  %2621 = vpow2.f32 %v1741_v15 }
 0x346   :  { %1767 = vadd.xlane.f32.xlu0 %v2616_v62  ;;  %v1696_v1 = vpop.xlane.xlu0 %1695 }
 0x347   :  { %v1721_v41 = vsub.f32 %v2994_v53, %v1696_v1 }
 0x348   :  { %v1698_v19 = vpop.xlane.xlu1 %1697 }
 0x349   :  { %v2618_v14 = vpop.eup %2617  ;;  %v1743_v33 = vmul.f32 1.442695, %v1721_v41  ;;  %v1722_v10 = vsub.f32 %v2998_v34, %v1698_v19 }
 0x34a   :  { %1769 = vadd.xlane.f32.xlu1 %v2618_v14 }
 0x34b   :  { %2623 = vpow2.f32 %v1743_v33  ;;  %v1745_v16 = vmul.f32 1.442695, %v1722_v10 }
 0x34d   :  { %v2620_v43 = vpop.eup %2619  ;;  %2625 = vpow2.f32 %v1745_v16 }
 0x34e   :  { %1771 = vadd.xlane.f32.xlu0 %v2620_v43  ;;  %v1700_v32 = vpop.xlane.xlu0 %1699 }
 0x34f   :  { %v2622_v17 = vpop.eup %2621  ;;  %v1723_v26 = vsub.f32 %v3002_v55, %v1700_v32 }
 0x350   :  { %v1702_v54 = vpop.xlane.xlu1 %1701  ;;  %1773 = vadd.xlane.f32.xlu1 %v2622_v17 }
 0x351   :  { %v1747_v44 = vmul.f32 1.442695, %v1723_v26  ;;  %v1724_v53 = vsub.f32 %v3006_v46, %v1702_v54 }
 0x353   :  { %2627 = vpow2.f32 %v1747_v44  ;;  %v1749_v50 = vmul.f32 1.442695, %v1724_v53 }
 0x355   :  { %v2624_v51 = vpop.eup %2623  ;;  %2629 = vpow2.f32 %v1749_v50 }
 0x356   :  { %1775 = vadd.xlane.f32.xlu0 %v2624_v51  ;;  %v1704_v34 = vpop.xlane.xlu0 %1703 }
 0x357   :  { %v2626_v48 = vpop.eup %2625  ;;  %v1725_v21 = vsub.f32 %v3010_v23, %v1704_v34 }
 0x358   :  { %v1706_v56 = vpop.xlane.xlu1 %1705  ;;  %1777 = vadd.xlane.f32.xlu1 %v2626_v48 }
 0x359   :  { %v1751_v57 = vmul.f32 1.442695, %v1725_v21  ;;  %v1726_v59 = vsub.f32 %v3014_v61, %v1706_v56 }
 0x35b   :  { %2631 = vpow2.f32 %v1751_v57  ;;  %v1753_v55 = vmul.f32 1.442695, %v1726_v59 }
 0x35d   :  { %v2628_v60 = vpop.eup %2627  ;;  %2633 = vpow2.f32 %v1753_v55 }
 0x35e   :  { %1779 = vadd.xlane.f32.xlu0 %v2628_v60  ;;  %v1708_v46 = vpop.xlane.xlu0 %1707 }
 0x35f   :  { %v2630_v47 = vpop.eup %2629  ;;  %v1727_v49 = vsub.f32 %v3018_v3, %v1708_v46 }
 0x360   :  { %v1710_v25 = vpop.xlane.xlu1 %1709  ;;  %1781 = vadd.xlane.f32.xlu1 %v2630_v47 }
 0x361   :  { %v1755_v35 = vmul.f32 1.442695, %v1727_v49  ;;  %v1728_v63 = vsub.f32 %v3022_v36, %v1710_v25 }
 0x363   :  { %2635 = vpow2.f32 %v1755_v35  ;;  %v1757_v23 = vmul.f32 1.442695, %v1728_v63 }
 0x365   :  { %v2632_v2 = vpop.eup %2631  ;;  %2637 = vpow2.f32 %v1757_v23 }
 0x366   :  { %1783 = vadd.xlane.f32.xlu0 %v2632_v2  ;;  %v1712_v61 = vpop.xlane.xlu0 %1711 }
 0x367   :  { %v2634_v4 = vpop.eup %2633  ;;  %v1729_v37 = vsub.f32 %v3026_v28, %v1712_v61 }
 0x368   :  { %v1714_v5 = vpop.xlane.xlu1 %1713  ;;  %1785 = vadd.xlane.f32.xlu1 %v2634_v4 }
 0x369   :  { %v1759_v6 = vmul.f32 1.442695, %v1729_v37  ;;  %v1730_v7 = vsub.f32 %v3030_v8, %v1714_v5 }
 0x36b   :  { %2639 = vpow2.f32 %v1759_v6  ;;  %v1761_v3 = vmul.f32 1.442695, %v1730_v7 }
 0x36d   :  { %v2636_v27 = vpop.eup %2635  ;;  %2641 = vpow2.f32 %v1761_v3 }
 0x36e   :  { %1787 = vadd.xlane.f32.xlu0 %v2636_v27 }
 0x36f   :  { %v2638_v36 = vpop.eup %2637 }
 0x370   :  { %1789 = vadd.xlane.f32.xlu1 %v2638_v36 }
 0x375   :  { %v2640_v38 = vpop.eup %2639 }
 0x376   :  { %1791 = vadd.xlane.f32.xlu0 %v2640_v38 }
 0x377   :  { %v2642_v30 = vpop.eup %2641 }
 0x378   :  { %1793 = vadd.xlane.f32.xlu1 %v2642_v30 }
 0x3cb   :  { %v1764_v11 = vpop.xlane.xlu0 %1763 }
 0x3cc   :  { %2643 = vrcp.f32 %v1764_v11 }
 0x3cf   :  { %v1766_v40 = vpop.xlane.xlu1 %1765 }
 0x3d0   :  { %2645 = vrcp.f32 %v1766_v40 }
 0x3d3   :  { %v1768_v28 = vpop.xlane.xlu0 %1767 }
 0x3d4   :  { %2647 = vrcp.f32 %v1768_v28 }
 0x3d6   :  { %v2644_v18 = vpop.eup %2643 }
 0x3d7   :  { %v1770_v13 = vpop.xlane.xlu1 %1769  ;;  %v1796_v20 = vmul.f32 %v2644_v18, %v3037_v24 }
 0x3d8   :  { %2649 = vrcp.f32 %v1770_v13 }
 0x3da   :  { %v2646_v8 = vpop.eup %2645 }
 0x3db   :  { %v1798_v9 = vmul.f32 %v2646_v8, %v3041_v0  ;;  %v1772_v22 = vpop.xlane.xlu0 %1771 }
 0x3dc   :  { %2651 = vrcp.f32 %v1772_v22 }
 0x3dd   :  { %v2106_v45 = vpack.c.bf16 %v1798_v9, %v1796_v20  ;;  %v1774_v29 = vpop.xlane.xlu1 %1773 }
 0x3de   :  { %2653 = vrcp.f32 %v1774_v29  ;;  %v2648_v12 = vpop.eup %2647 }
 0x3df   :  { %2107 = vst [vmem:[#allocation7] sm:$0xff] %v2106_v45  }
 0x3e2   :  { %v2650_v39 = vpop.eup %2649 }
 0x3e3   :  { %v1776_v52 = vpop.xlane.xlu0 %1775 }
 0x3e4   :  { %2655 = vrcp.f32 %v1776_v52 }
 0x3e5   :  { %v1778_v42 = vpop.xlane.xlu1 %1777 }
 0x3e6   :  { %v2652_v31 = vpop.eup %2651  ;;  %v1924_v58 = vld [vmem:[#allocation7] sm:$0xf]  ;;  %2657 = vrcp.f32 %v1778_v42 }
 0x3e7   :  { %1925 = vst [vmem:[%s3065_s5] sm:$0xf] %v1924_v58 }
 0x3e8   :  { %v2654_v24 = vpop.eup %2653 }
 0x3eb   :  { %v1780_v0 = vpop.xlane.xlu0 %1779 }
 0x3ec   :  { %2659 = vrcp.f32 %v1780_v0 }
 0x3ed   :  { %v1782_v15 = vpop.xlane.xlu1 %1781 }
 0x3ee   :  { %v2656_v62 = vpop.eup %2655  ;;  %2661 = vrcp.f32 %v1782_v15 }
 0x3f0   :  { %v2658_v1 = vpop.eup %2657 }
 0x3f3   :  { %v1784_v41 = vpop.xlane.xlu0 %1783 }
 0x3f4   :  { %2663 = vrcp.f32 %v1784_v41 }
 0x3f5   :  { %v1786_v19 = vpop.xlane.xlu1 %1785 }
 0x3f6   :  { %v2660_v14 = vpop.eup %2659  ;;  %2665 = vrcp.f32 %v1786_v19 }
 0x3f8   :  { %v2662_v33 = vpop.eup %2661 }
 0x3fb   :  { %v1788_v10 = vpop.xlane.xlu0 %1787 }
 0x3fc   :  { %2667 = vrcp.f32 %v1788_v10 }
 0x3fd   :  { %v1790_v16 = vpop.xlane.xlu1 %1789 }
 0x3fe   :  { %v2664_v43 = vpop.eup %2663  ;;  %2669 = vrcp.f32 %v1790_v16 }
 0x400   :  { %v2666_v32 = vpop.eup %2665 }
 0x403   :  { %v1792_v17 = vpop.xlane.xlu0 %1791 }
 0x404   :  { %2671 = vrcp.f32 %v1792_v17 }
 0x405   :  { %v1794_v26 = vpop.xlane.xlu1 %1793 }
 0x406   :  { %v2668_v54 = vpop.eup %2667  ;;  %2673 = vrcp.f32 %v1794_v26 }
 0x408   :  { %v2670_v44 = vpop.eup %2669 }
 0x40e   :  { %v2672_v53 = vpop.eup %2671 }
 0x410   :  { %v2674_v50 = vpop.eup %2673 }
 0x411   :  { %1942 = vsyncpa [#allocation3], 1 }
 0x412   :  { %1943 = vsyncpa [#allocation5], 1 }

</bundles_post_ra>
